<compile_context>
chip_gen: v7x
topology: tpu7x:2x2x1
jax: 0.10.0
libtpu: 0.0.40
codegen_flags: <defaults>
</compile_context>

<pallas_src>
import jax
import jax.numpy as jnp
import numpy as np
from jax.experimental import pallas as pl
from jax.experimental.pallas import tpu as pltpu

EPS = 1e-5                      # torch.nn.BatchNorm2d default
ACT_DTYPE = jnp.float32         # storage dtype of the h1 intermediate
TM_UP = 512                     # lane-tile (columns) for the upsampled passes


# ---------------------------------------------------------------------------
# Pallas kernels
# ---------------------------------------------------------------------------
def stats_shortcut_kernel(x_ref, w_ref, b_ref, sc_ref, ssum_ref, ssq_ref):
    """Pass A: BN1 sum/sumsq accumulation + 1x1 shortcut conv (low resolution)."""
    @pl.when(pl.program_id(0) == 0)
    def _():
        ssum_ref[...] = jnp.zeros_like(ssum_ref)
        ssq_ref[...] = jnp.zeros_like(ssq_ref)

    x = x_ref[...]                                              # (Cin, TM0)
    sc_ref[...] = (jnp.dot(w_ref[...], x, preferred_element_type=jnp.float32)
                   + b_ref[...]).astype(sc_ref.dtype)           # (Cout, TM0)
    ssum_ref[...] += jnp.sum(x, axis=1, keepdims=True)
    ssq_ref[...] += jnp.sum(x * x, axis=1, keepdims=True)


def conv1_kernel(win_ref, mwin_ref, mout_ref, w_ref, b_ref, scale_ref, shift_ref,
                 h_ref, ssum_ref, ssq_ref):
    """Pass B: c1 3x3 conv with fused BN1+ReLU on the input slab and on-the-fly
    BN2 sum/sumsq accumulation.  9 shifted-slice taps, no HBM im2col."""
    TM = h_ref.shape[1]
    TMe = win_ref.shape[2]
    halo = (TMe - TM) // 2
    Wp = halo - 1                                               # padded width

    @pl.when(pl.program_id(0) == 0)
    def _():
        ssum_ref[...] = jnp.zeros_like(ssum_ref)
        ssq_ref[...] = jnp.zeros_like(ssq_ref)

    a = win_ref[0].astype(jnp.float32)                          # (Cin, TMe)
    # BN1 affine + ReLU; mask restores exact zeros at conv-padding positions.
    a = jnp.maximum(a * scale_ref[...] + shift_ref[...], 0.0) * mwin_ref[0]

    acc = jnp.zeros((h_ref.shape[0], TM), jnp.float32)
    for k in range(9):                                          # 3x3 taps
        off = (k // 3) * Wp + (k % 3)
        acc = acc + jnp.dot(w_ref[k], a[:, off:off + TM],
                            preferred_element_type=jnp.float32)

    # Zero non-valid columns: keeps BN2 stats exact and doubles as c2's padding.
    out = (acc + b_ref[...]) * mout_ref[...]
    h_ref[...] = out.astype(h_ref.dtype)
    ssum_ref[...] += jnp.sum(out, axis=1, keepdims=True)
    ssq_ref[...] += jnp.sum(out * out, axis=1, keepdims=True)


def conv2_add_kernel(win_ref, mwin_ref, w_ref, b_ref, scale_ref, shift_ref,
                     res_ref, o_ref):
    """Pass C: c2 3x3 conv with fused BN2+ReLU on the input slab + residual add."""
    TM = o_ref.shape[1]
    TMe = win_ref.shape[2]
    halo = (TMe - TM) // 2
    Wp = halo - 1

    a = win_ref[0].astype(jnp.float32)                          # (Chid, TMe)
    a = jnp.maximum(a * scale_ref[...] + shift_ref[...], 0.0) * mwin_ref[0]

    acc = jnp.zeros((o_ref.shape[0], TM), jnp.float32)
    for k in range(9):
        off = (k // 3) * Wp + (k % 3)
        acc = acc + jnp.dot(w_ref[k], a[:, off:off + TM],
                            preferred_element_type=jnp.float32)

    o_ref[...] = (acc + b_ref[...] + res_ref[...]).astype(o_ref.dtype)


# ---------------------------------------------------------------------------
# JAX glue (pure data movement) and small helpers
# ---------------------------------------------------------------------------
def _pick_tile(M, target=1024):
    """Largest multiple of 128 that divides M and is <= target."""
    assert M % 128 == 0, "flattened batch*spatial size must be a multiple of 128"
    best, t = 128, 128
    while t <= min(M, target):
        if M % t == 0:
            best = t
        t += 128
    return best


def _prep_conv3x3(w):
    """PyTorch (Cout, Cin, 3, 3) -> tap-major (9, Cout, Cin), tap k = 3*dy + dx."""
    return jnp.transpose(w, (2, 3, 0, 1)).reshape(9, w.shape[0], w.shape[1])


def _upsample2x_pad_flat(a_cm, N, H, W):
    """(C, N*H*W) -> nearest-2x upsample -> zero pad 1 -> flat (C, N*Hp*Wp)."""
    C = a_cm.shape[0]
    a = a_cm.reshape(C, N, H, W)
    a = jnp.repeat(jnp.repeat(a, 2, axis=2), 2, axis=3)
    a = jnp.pad(a, ((0, 0), (0, 0), (1, 1), (1, 1)))
    return a.reshape(C, N * (2 * H + 2) * (2 * W + 2))


def _make_windows(a_flat, TM, halo, nt):
    """(C, M) padded-flat -> overlapping halo'd windows (nt, C, TM + 2*halo)."""
    C, M = a_flat.shape
    MT = nt * TM
    ext = jnp.pad(a_flat, ((0, 0), (halo, MT - M + halo)))
    idx = jnp.arange(nt)[:, None] * TM + jnp.arange(TM + 2 * halo)[None, :]
    return jnp.transpose(ext[:, idx], (1, 0, 2))


def _valid_mask_flat(N, H2, W2):
    """1.0 at real (non conv-padding) positions of the padded-flat layout."""
    Hp, Wp = H2 + 2, W2 + 2
    m = np.zeros((N, Hp, Wp), np.float32)
    m[:, 1:1 + H2, 1:1 + W2] = 1.0
    return jnp.asarray(m.reshape(1, N * Hp * Wp))


def _bn_scale_shift(ssum, ssq, count, gamma, beta):
    """Training-mode BN (biased var) folded into a per-channel affine."""
    mean = ssum[:, 0] / count
    var = jnp.maximum(ssq[:, 0] / count - mean * mean, 0.0)
    scale = gamma * jax.lax.rsqrt(var + EPS)
    shift = beta - mean * scale
    return scale[:, None].astype(jnp.float32), shift[:, None].astype(jnp.float32)


# ---------------------------------------------------------------------------
# GenBlock forward (Pallas)
# ---------------------------------------------------------------------------
def gen_block_forward(params, x_nchw):
    N, Cin, H, W = x_nchw.shape
    Chid = params["c1_w"].shape[0]
    Cout = params["c2_w"].shape[0]
    H2, W2 = 2 * H, 2 * W
    Hp, Wp = H2 + 2, W2 + 2
    M0 = N * H * W                       # original-resolution positions
    M1 = N * H2 * W2                     # upsampled valid positions
    Mp = N * Hp * Wp                     # upsampled padded-flat positions

    TM0 = _pick_tile(M0)
    TM = TM_UP
    nt = -(-Mp // TM)                    # cdiv
    MT = nt * TM
    halo = Wp + 1

    x_cm = jnp.transpose(x_nchw, (1, 0, 2, 3)).reshape(Cin, M0)   # channel-major
    csc_w = params["csc_w"].reshape(Cout, Cin)
    csc_b = params["csc_b"].reshape(Cout, 1)

    # --- Pass A: BN1 stats + 1x1 shortcut conv at ORIGINAL resolution ---------
    sc_cm, s1, q1 = pl.pallas_call(
        stats_shortcut_kernel,
        out_shape=(jax.ShapeDtypeStruct((Cout, M0), jnp.float32),
                   jax.ShapeDtypeStruct((Cin, 1), jnp.float32),
                   jax.ShapeDtypeStruct((Cin, 1), jnp.float32)),
        grid=(M0 // TM0,),
        in_specs=[pl.BlockSpec((Cin, TM0), lambda t: (0, t)),
                  pl.BlockSpec((Cout, Cin), lambda t: (0, 0)),
                  pl.BlockSpec((Cout, 1), lambda t: (0, 0))],
        out_specs=(pl.BlockSpec((Cout, TM0), lambda t: (0, t)),
                   pl.BlockSpec((Cin, 1), lambda t: (0, 0)),
                   pl.BlockSpec((Cin, 1), lambda t: (0, 0))),
        compiler_params=pltpu.CompilerParams(dimension_semantics=("arbitrary",)),
    )(x_cm, csc_w, csc_b)

    scale1, shift1 = _bn_scale_shift(s1, q1, M0,
                                     params["bn1_gamma"], params["bn1_beta"])

    # --- c1 input formation (data movement only) -------------------------------
    xin = _upsample2x_pad_flat(x_cm, N, H, W)          # raw x, upsampled + padded
    win1 = _make_windows(xin, TM, halo, nt)            # (nt, Cin, TM + 2*halo)
    mask_flat = _valid_mask_flat(N, H2, W2)            # constant
    mask_win = _make_windows(mask_flat, TM, halo, nt)  # (nt, 1, TM + 2*halo)
    mask_out = jnp.pad(mask_flat, ((0, 0), (0, MT - Mp)))
    w1 = _prep_conv3x3(params["c1_w"])
    b1 = params["c1_b"].reshape(Chid, 1)
    TMe = TM + 2 * halo

    # --- Pass B: c1 conv (BN1+ReLU fused in, BN2 stats fused out) --------------
    h1pad, s2, q2 = pl.pallas_call(
        conv1_kernel,
        out_shape=(jax.ShapeDtypeStruct((Chid, MT), ACT_DTYPE),
                   jax.ShapeDtypeStruct((Chid, 1), jnp.float32),
                   jax.ShapeDtypeStruct((Chid, 1), jnp.float32)),
        grid=(nt,),
        in_specs=[pl.BlockSpec((1, Cin, TMe), lambda t: (t, 0, 0)),
                  pl.BlockSpec((1, 1, TMe), lambda t: (t, 0, 0)),
                  pl.BlockSpec((1, TM), lambda t: (0, t)),
                  pl.BlockSpec((9, Chid, Cin), lambda t: (0, 0, 0)),
                  pl.BlockSpec((Chid, 1), lambda t: (0, 0)),
                  pl.BlockSpec((Cin, 1), lambda t: (0, 0)),
                  pl.BlockSpec((Cin, 1), lambda t: (0, 0))],
        out_specs=(pl.BlockSpec((Chid, TM), lambda t: (0, t)),
                   pl.BlockSpec((Chid, 1), lambda t: (0, 0)),
                   pl.BlockSpec((Chid, 1), lambda t: (0, 0))),
        compiler_params=pltpu.CompilerParams(dimension_semantics=("arbitrary",)),
    )(win1, mask_win, mask_out, w1, b1, scale1, shift1)

    scale2, shift2 = _bn_scale_shift(s2, q2, M1,
                                     params["bn2_gamma"], params["bn2_beta"])

    # --- Pass C inputs ----------------------------------------------------------
    win2 = _make_windows(h1pad, TM, halo, nt)          # (nt, Chid, TM + 2*halo)
    res = _upsample2x_pad_flat(sc_cm, N, H, W)         # shortcut -> upsampled grid
    res = jnp.pad(res, ((0, 0), (0, MT - Mp)))
    w2 = _prep_conv3x3(params["c2_w"])
    b2 = params["c2_b"].reshape(Cout, 1)

    # --- Pass C: c2 conv (BN2+ReLU fused in) + residual add --------------------
    out_pad = pl.pallas_call(
        conv2_add_kernel,
        out_shape=jax.ShapeDtypeStruct((Cout, MT), jnp.float32),
        grid=(nt,),
        in_specs=[pl.BlockSpec((1, Chid, TMe), lambda t: (t, 0, 0)),
                  pl.BlockSpec((1, 1, TMe), lambda t: (t, 0, 0)),
                  pl.BlockSpec((9, Cout, Chid), lambda t: (0, 0, 0)),
                  pl.BlockSpec((Cout, 1), lambda t: (0, 0)),
                  pl.BlockSpec((Chid, 1), lambda t: (0, 0)),
                  pl.BlockSpec((Chid, 1), lambda t: (0, 0)),
                  pl.BlockSpec((Cout, TM), lambda t: (0, t))],
        out_specs=pl.BlockSpec((Cout, TM), lambda t: (0, t)),
        compiler_params=pltpu.CompilerParams(dimension_semantics=("parallel",)),
    )(win2, mask_win, w2, b2, scale2, shift2, res)

    out = out_pad[:, :Mp].reshape(Cout, N, Hp, Wp)[:, :, 1:1 + H2, 1:1 + W2]
    return jnp.transpose(out, (1, 0, 2, 3))            # -> NCHW


# ---------------------------------------------------------------------------
# Pure-JAX reference mirroring the PyTorch module (NCHW, OIHW weights)
# ---------------------------------------------------------------------------
def gen_block_ref(params, x):
    def bn(h, g, b):
        mean = jnp.mean(h, axis=(0, 2, 3), keepdims=True)
        var = jnp.mean((h - mean) ** 2, axis=(0, 2, 3), keepdims=True)
        return ((h - mean) * jax.lax.rsqrt(var + EPS) * g.reshape(1, -1, 1, 1)
                + b.reshape(1, -1, 1, 1))

    def up(h):
        return jnp.repeat(jnp.repeat(h, 2, axis=2), 2, axis=3)

    def conv(h, w, b, pad):
        o = jax.lax.conv_general_dilated(
            h, w, window_strides=(1, 1), padding=[(pad, pad), (pad, pad)],
            dimension_numbers=("NCHW", "OIHW", "NCHW"),
            precision=jax.lax.Precision.HIGHEST)
        return o + b.reshape(1, -1, 1, 1)

    h = jnp.maximum(bn(x, params["bn1_gamma"], params["bn1_beta"]), 0.0)
    h = conv(up(h), params["c1_w"], params["c1_b"], 1)
    h = jnp.maximum(bn(h, params["bn2_gamma"], params["bn2_beta"]), 0.0)
    h = conv(h, params["c2_w"], params["c2_b"], 1)
    sc = conv(up(x), params["csc_w"], params["csc_b"], 0)
    return h + sc


# ---------------------------------------------------------------------------
def make_params(key, in_channels, hidden_channels, out_channels):
    ks = jax.random.split(key, 6)
    return {
        # PyTorch layouts: conv weight (Cout, Cin, kH, kW), bias (Cout,)
        "c1_w": 0.05 * jax.random.normal(ks[0], (hidden_channels, in_channels, 3, 3), jnp.float32),
        "c1_b": 0.01 * jax.random.normal(ks[1], (hidden_channels,), jnp.float32),
        "c2_w": 0.05 * jax.random.normal(ks[2], (out_channels, hidden_channels, 3, 3), jnp.float32),
        "c2_b": 0.01 * jax.random.normal(ks[3], (out_channels,), jnp.float32),
        "csc_w": 0.05 * jax.random.normal(ks[4], (out_channels, in_channels, 1, 1), jnp.float32),
        "csc_b": 0.01 * jax.random.normal(ks[5], (out_channels,), jnp.float32),
        # BatchNorm affine params (torch default init: gamma=1, beta=0)
        "bn1_gamma": jnp.ones((in_channels,), jnp.float32),
        "bn1_beta": jnp.zeros((in_channels,), jnp.float32),
        "bn2_gamma": jnp.ones((hidden_channels,), jnp.float32),
        "bn2_beta": jnp.zeros((hidden_channels,), jnp.float32),
    }


if __name__ == "__main__":
    key = jax.random.PRNGKey(0)
    k_x, k_p = jax.random.split(key)

    N, Cin, H, W = 2, 4, 16, 16
    Cout, hidden = 8, 8

    x = jax.random.normal(k_x, (N, Cin, H, W), jnp.float32)
    params = make_params(k_p, Cin, hidden, Cout)

    out = jax.jit(gen_block_forward)(params, x)
    out = jax.block_until_ready(out)

    ref = gen_block_ref(params, x)
    assert out.shape == (N, Cout, 2 * H, 2 * W), out.shape
    assert jnp.allclose(out, ref, rtol=5e-3, atol=5e-3), \
        float(jnp.max(jnp.abs(out - ref)))

    print("KERNEL_OK")
</pallas_src>

<mosaic_0001>
module attributes {stable_mosaic.version = 11 : i64} {
  func.func @stats_shortcut_kernel(%arg0: i32, %arg1: memref<4x512xf32, #tpu.memory_space<vmem>>, %arg2: memref<8x4xf32, #tpu.memory_space<vmem>>, %arg3: memref<8x1xf32, #tpu.memory_space<vmem>>, %arg4: memref<8x512xf32, #tpu.memory_space<vmem>>, %arg5: memref<4x1xf32, #tpu.memory_space<vmem>>, %arg6: memref<4x1xf32, #tpu.memory_space<vmem>>) attributes {dimension_semantics = [#tpu.dimension_semantics<arbitrary>], iteration_bounds = array<i64: 1>, scalar_prefetch = 0 : i64, scratch_operands = 0 : i64, tpu.core_type = #tpu.core_type<tc>, window_params = [{transform_indices = @transform_0, window_bounds = array<i64: 4, 512>}, {pipeline_mode = #tpu.pipeline_mode<synchronous>, transform_indices = @transform_1, window_bounds = array<i64: 8, 4>}, {pipeline_mode = #tpu.pipeline_mode<synchronous>, transform_indices = @transform_2, window_bounds = array<i64: 8, 1>}, {transform_indices = @transform_3, window_bounds = array<i64: 8, 512>}, {pipeline_mode = #tpu.pipeline_mode<synchronous>, transform_indices = @transform_4, window_bounds = array<i64: 4, 1>}, {pipeline_mode = #tpu.pipeline_mode<synchronous>, transform_indices = @transform_5, window_bounds = array<i64: 4, 1>}]} {
    %c0_i32 = arith.constant 0 : i32
    %0 = arith.cmpi eq, %arg0, %c0_i32 : i32
    %1 = arith.extui %0 : i1 to i32
    %c0_i32_0 = arith.constant 0 : i32
    %2 = arith.cmpi ne, %1, %c0_i32_0 : i32
    scf.if %2 {
      %cst_18 = arith.constant 0.000000e+00 : f32
      %21 = vector.broadcast %cst_18 : f32 to vector<4x1xf32>
      %c0_19 = arith.constant 0 : index
      %c0_20 = arith.constant 0 : index
      %22 = vector.load %arg5[%c0_19, %c0_20] : memref<4x1xf32, #tpu.memory_space<vmem>>, vector<4x1xf32>
      tpu.vector_store %arg5[%c0_19, %c0_20], %21 {strides = array<i32>} : memref<4x1xf32, #tpu.memory_space<vmem>>, vector<4x1xf32>,
      %cst_21 = arith.constant 0.000000e+00 : f32
      %23 = vector.broadcast %cst_21 : f32 to vector<4x1xf32>
      %c0_22 = arith.constant 0 : index
      %c0_23 = arith.constant 0 : index
      %24 = vector.load %arg6[%c0_22, %c0_23] : memref<4x1xf32, #tpu.memory_space<vmem>>, vector<4x1xf32>
      tpu.vector_store %arg6[%c0_22, %c0_23], %23 {strides = array<i32>} : memref<4x1xf32, #tpu.memory_space<vmem>>, vector<4x1xf32>,
    } else {
    }
    %c0 = arith.constant 0 : index
    %c0_1 = arith.constant 0 : index
    %3 = vector.load %arg1[%c0, %c0_1] : memref<4x512xf32, #tpu.memory_space<vmem>>, vector<4x512xf32>
    %c0_2 = arith.constant 0 : index
    %c0_3 = arith.constant 0 : index
    %4 = vector.load %arg2[%c0_2, %c0_3] : memref<8x4xf32, #tpu.memory_space<vmem>>, vector<8x4xf32>
    %cst = arith.constant dense<0.000000e+00> : vector<8x512xf32>
    %5 = tpu.matmul %4, %3, %cst {dimension_numbers = #tpu.dot_dimension_numbers<[1], [0], [0], [1], [0, 0, 1, 1], [], []>} : vector<8x4xf32>, vector<4x512xf32>, vector<8x512xf32> -> vector<8x512xf32>
    %c0_4 = arith.constant 0 : index
    %c0_5 = arith.constant 0 : index
    %6 = vector.load %arg3[%c0_4, %c0_5] : memref<8x1xf32, #tpu.memory_space<vmem>>, vector<8x1xf32>
    %7 = vector.broadcast %6 : vector<8x1xf32> to vector<8x512xf32>
    %8 = arith.addf %5, %7 : vector<8x512xf32>
    %c0_6 = arith.constant 0 : index
    %c0_7 = arith.constant 0 : index
    %9 = vector.load %arg4[%c0_6, %c0_7] : memref<8x512xf32, #tpu.memory_space<vmem>>, vector<8x512xf32>
    tpu.vector_store %arg4[%c0_6, %c0_7], %8 {strides = array<i32>} : memref<8x512xf32, #tpu.memory_space<vmem>>, vector<8x512xf32>,
    %c0_8 = arith.constant 0 : index
    %c0_9 = arith.constant 0 : index
    %10 = vector.load %arg5[%c0_8, %c0_9] : memref<4x1xf32, #tpu.memory_space<vmem>>, vector<4x1xf32>
    %cst_10 = arith.constant dense<0.000000e+00> : vector<4xf32>
    %11 = vector.multi_reduction <add>, %3, %cst_10 [1] : vector<4x512xf32> to vector<4xf32>
    %12 = vector.shape_cast %11 : vector<4xf32> to vector<4x1xf32>
    %13 = arith.addf %10, %12 : vector<4x1xf32>
    %c0_11 = arith.constant 0 : index
    %c0_12 = arith.constant 0 : index
    %14 = vector.load %arg5[%c0_11, %c0_12] : memref<4x1xf32, #tpu.memory_space<vmem>>, vector<4x1xf32>
    tpu.vector_store %arg5[%c0_11, %c0_12], %13 {strides = array<i32>} : memref<4x1xf32, #tpu.memory_space<vmem>>, vector<4x1xf32>,
    %c0_13 = arith.constant 0 : index
    %c0_14 = arith.constant 0 : index
    %15 = vector.load %arg6[%c0_13, %c0_14] : memref<4x1xf32, #tpu.memory_space<vmem>>, vector<4x1xf32>
    %16 = arith.mulf %3, %3 : vector<4x512xf32>
    %cst_15 = arith.constant dense<0.000000e+00> : vector<4xf32>
    %17 = vector.multi_reduction <add>, %16, %cst_15 [1] : vector<4x512xf32> to vector<4xf32>
    %18 = vector.shape_cast %17 : vector<4xf32> to vector<4x1xf32>
    %19 = arith.addf %15, %18 : vector<4x1xf32>
    %c0_16 = arith.constant 0 : index
    %c0_17 = arith.constant 0 : index
    %20 = vector.load %arg6[%c0_16, %c0_17] : memref<4x1xf32, #tpu.memory_space<vmem>>, vector<4x1xf32>
    tpu.vector_store %arg6[%c0_16, %c0_17], %19 {strides = array<i32>} : memref<4x1xf32, #tpu.memory_space<vmem>>, vector<4x1xf32>,
    return
  }
  func.func @transform_0(%arg0: i32) -> (i32, i32) {
    %c0_i32 = arith.constant 0 : i32
    %c0_i32_0 = arith.constant 0 : i32
    return %c0_i32, %arg0 : i32, i32
  }
  func.func @transform_1(%arg0: i32) -> (i32, i32) {
    %c0_i32 = arith.constant 0 : i32
    %c0_i32_0 = arith.constant 0 : i32
    %c0_i32_1 = arith.constant 0 : i32
    return %c0_i32, %c0_i32_0 : i32, i32
  }
  func.func @transform_2(%arg0: i32) -> (i32, i32) {
    %c0_i32 = arith.constant 0 : i32
    %c0_i32_0 = arith.constant 0 : i32
    %c0_i32_1 = arith.constant 0 : i32
    return %c0_i32, %c0_i32_0 : i32, i32
  }
  func.func @transform_3(%arg0: i32) -> (i32, i32) {
    %c0_i32 = arith.constant 0 : i32
    %c0_i32_0 = arith.constant 0 : i32
    return %c0_i32, %arg0 : i32, i32
  }
  func.func @transform_4(%arg0: i32) -> (i32, i32) {
    %c0_i32 = arith.constant 0 : i32
    %c0_i32_0 = arith.constant 0 : i32
    %c0_i32_1 = arith.constant 0 : i32
    return %c0_i32, %c0_i32_0 : i32, i32
  }
  func.func @transform_5(%arg0: i32) -> (i32, i32) {
    %c0_i32 = arith.constant 0 : i32
    %c0_i32_0 = arith.constant 0 : i32
    %c0_i32_1 = arith.constant 0 : i32
    return %c0_i32, %c0_i32_0 : i32, i32
  }
}

module attributes {stable_mosaic.version = 11 : i64} {
  func.func @conv1_kernel(%arg0: i32, %arg1: memref<1x4x582xf32, #tpu.memory_space<vmem>>, %arg2: memref<1x1x582xf32, #tpu.memory_space<vmem>>, %arg3: memref<1x512xf32, #tpu.memory_space<vmem>>, %arg4: memref<9x8x4xf32, #tpu.memory_space<vmem>>, %arg5: memref<8x1xf32, #tpu.memory_space<vmem>>, %arg6: memref<4x1xf32, #tpu.memory_space<vmem>>, %arg7: memref<4x1xf32, #tpu.memory_space<vmem>>, %arg8: memref<8x512xf32, #tpu.memory_space<vmem>>, %arg9: memref<8x1xf32, #tpu.memory_space<vmem>>, %arg10: memref<8x1xf32, #tpu.memory_space<vmem>>) attributes {dimension_semantics = [#tpu.dimension_semantics<arbitrary>], iteration_bounds = array<i64: 5>, scalar_prefetch = 0 : i64, scratch_operands = 0 : i64, tpu.core_type = #tpu.core_type<tc>, window_params = [{transform_indices = @transform_0, window_bounds = array<i64: 1, 4, 582>}, {transform_indices = @transform_1, window_bounds = array<i64: 1, 1, 582>}, {transform_indices = @transform_2, window_bounds = array<i64: 1, 512>}, {pipeline_mode = #tpu.pipeline_mode<synchronous>, transform_indices = @transform_3, window_bounds = array<i64: 9, 8, 4>}, {pipeline_mode = #tpu.pipeline_mode<synchronous>, transform_indices = @transform_4, window_bounds = array<i64: 8, 1>}, {pipeline_mode = #tpu.pipeline_mode<synchronous>, transform_indices = @transform_5, window_bounds = array<i64: 4, 1>}, {pipeline_mode = #tpu.pipeline_mode<synchronous>, transform_indices = @transform_6, window_bounds = array<i64: 4, 1>}, {transform_indices = @transform_7, window_bounds = array<i64: 8, 512>}, {pipeline_mode = #tpu.pipeline_mode<synchronous>, transform_indices = @transform_8, window_bounds = array<i64: 8, 1>}, {pipeline_mode = #tpu.pipeline_mode<synchronous>, transform_indices = @transform_9, window_bounds = array<i64: 8, 1>}]} {
    %c0_i32 = arith.constant 0 : i32
    %0 = arith.cmpi eq, %arg0, %c0_i32 : i32
    %1 = arith.extui %0 : i1 to i32
    %c0_i32_0 = arith.constant 0 : i32
    %2 = arith.cmpi ne, %1, %c0_i32_0 : i32
    scf.if %2 {
      %cst_55 = arith.constant 0.000000e+00 : f32
      %81 = vector.broadcast %cst_55 : f32 to vector<8x1xf32>
      %c0_56 = arith.constant 0 : index
      %c0_57 = arith.constant 0 : index
      %82 = vector.load %arg9[%c0_56, %c0_57] : memref<8x1xf32, #tpu.memory_space<vmem>>, vector<8x1xf32>
      tpu.vector_store %arg9[%c0_56, %c0_57], %81 {strides = array<i32>} : memref<8x1xf32, #tpu.memory_space<vmem>>, vector<8x1xf32>,
      %cst_58 = arith.constant 0.000000e+00 : f32
      %83 = vector.broadcast %cst_58 : f32 to vector<8x1xf32>
      %c0_59 = arith.constant 0 : index
      %c0_60 = arith.constant 0 : index
      %84 = vector.load %arg10[%c0_59, %c0_60] : memref<8x1xf32, #tpu.memory_space<vmem>>, vector<8x1xf32>
      tpu.vector_store %arg10[%c0_59, %c0_60], %83 {strides = array<i32>} : memref<8x1xf32, #tpu.memory_space<vmem>>, vector<8x1xf32>,
    } else {
    }
    %c0 = arith.constant 0 : index
    %c0_1 = arith.constant 0 : index
    %c0_2 = arith.constant 0 : index
    %3 = vector.load %arg1[%c0, %c0_1, %c0_2] : memref<1x4x582xf32, #tpu.memory_space<vmem>>, vector<1x4x582xf32>
    %4 = vector.shape_cast %3 : vector<1x4x582xf32> to vector<4x582xf32>
    %c0_3 = arith.constant 0 : index
    %c0_4 = arith.constant 0 : index
    %5 = vector.load %arg6[%c0_3, %c0_4] : memref<4x1xf32, #tpu.memory_space<vmem>>, vector<4x1xf32>
    %6 = vector.broadcast %5 : vector<4x1xf32> to vector<4x582xf32>
    %7 = arith.mulf %4, %6 : vector<4x582xf32>
    %c0_5 = arith.constant 0 : index
    %c0_6 = arith.constant 0 : index
    %8 = vector.load %arg7[%c0_5, %c0_6] : memref<4x1xf32, #tpu.memory_space<vmem>>, vector<4x1xf32>
    %9 = vector.broadcast %8 : vector<4x1xf32> to vector<4x582xf32>
    %10 = arith.addf %7, %9 : vector<4x582xf32>
    %cst = arith.constant 0.000000e+00 : f32
    %11 = vector.broadcast %cst : f32 to vector<4x582xf32>
    %12 = arith.maximumf %10, %11 : vector<4x582xf32>
    %c0_7 = arith.constant 0 : index
    %c0_8 = arith.constant 0 : index
    %c0_9 = arith.constant 0 : index
    %13 = vector.load %arg2[%c0_7, %c0_8, %c0_9] : memref<1x1x582xf32, #tpu.memory_space<vmem>>, vector<1x1x582xf32>
    %14 = vector.shape_cast %13 : vector<1x1x582xf32> to vector<1x582xf32>
    %15 = vector.broadcast %14 : vector<1x582xf32> to vector<4x582xf32>
    %16 = arith.mulf %12, %15 : vector<4x582xf32>
    %cst_10 = arith.constant 0.000000e+00 : f32
    %17 = vector.broadcast %cst_10 : f32 to vector<8x512xf32>
    %c0_11 = arith.constant 0 : index
    %c0_12 = arith.constant 0 : index
    %c0_13 = arith.constant 0 : index
    %18 = vector.load %arg4[%c0_11, %c0_12, %c0_13] : memref<9x8x4xf32, #tpu.memory_space<vmem>>, vector<1x8x4xf32>
    %19 = vector.shape_cast %18 : vector<1x8x4xf32> to vector<8x4xf32>
    %20 = vector.extract_strided_slice %16 {offsets = [0, 0], sizes = [4, 512], strides = [1, 1]} : vector<4x582xf32> to vector<4x512xf32>
    %cst_14 = arith.constant dense<0.000000e+00> : vector<8x512xf32>
    %21 = tpu.matmul %19, %20, %cst_14 {dimension_numbers = #tpu.dot_dimension_numbers<[1], [0], [0], [1], [0, 0, 1, 1], [], []>} : vector<8x4xf32>, vector<4x512xf32>, vector<8x512xf32> -> vector<8x512xf32>
    %22 = arith.addf %17, %21 : vector<8x512xf32>
    %c1 = arith.constant 1 : index
    %c0_15 = arith.constant 0 : index
    %c0_16 = arith.constant 0 : index
    %23 = vector.load %arg4[%c1, %c0_15, %c0_16] : memref<9x8x4xf32, #tpu.memory_space<vmem>>, vector<1x8x4xf32>
    %24 = vector.shape_cast %23 : vector<1x8x4xf32> to vector<8x4xf32>
    %25 = vector.extract_strided_slice %16 {offsets = [0, 1], sizes = [4, 512], strides = [1, 1]} : vector<4x582xf32> to vector<4x512xf32>
    %cst_17 = arith.constant dense<0.000000e+00> : vector<8x512xf32>
    %26 = tpu.matmul %24, %25, %cst_17 {dimension_numbers = #tpu.dot_dimension_numbers<[1], [0], [0], [1], [0, 0, 1, 1], [], []>} : vector<8x4xf32>, vector<4x512xf32>, vector<8x512xf32> -> vector<8x512xf32>
    %27 = arith.addf %22, %26 : vector<8x512xf32>
    %c2 = arith.constant 2 : index
    %c0_18 = arith.constant 0 : index
    %c0_19 = arith.constant 0 : index
    %28 = vector.load %arg4[%c2, %c0_18, %c0_19] : memref<9x8x4xf32, #tpu.memory_space<vmem>>, vector<1x8x4xf32>
    %29 = vector.shape_cast %28 : vector<1x8x4xf32> to vector<8x4xf32>
    %30 = vector.extract_strided_slice %16 {offsets = [0, 2], sizes = [4, 512], strides = [1, 1]} : vector<4x582xf32> to vector<4x512xf32>
    %cst_20 = arith.constant dense<0.000000e+00> : vector<8x512xf32>
    %31 = tpu.matmul %29, %30, %cst_20 {dimension_numbers = #tpu.dot_dimension_numbers<[1], [0], [0], [1], [0, 0, 1, 1], [], []>} : vector<8x4xf32>, vector<4x512xf32>, vector<8x512xf32> -> vector<8x512xf32>
    %32 = arith.addf %27, %31 : vector<8x512xf32>
    %c3 = arith.constant 3 : index
    %c0_21 = arith.constant 0 : index
    %c0_22 = arith.constant 0 : index
    %33 = vector.load %arg4[%c3, %c0_21, %c0_22] : memref<9x8x4xf32, #tpu.memory_space<vmem>>, vector<1x8x4xf32>
    %34 = vector.shape_cast %33 : vector<1x8x4xf32> to vector<8x4xf32>
    %35 = vector.extract_strided_slice %16 {offsets = [0, 34], sizes = [4, 512], strides = [1, 1]} : vector<4x582xf32> to vector<4x512xf32>
    %cst_23 = arith.constant dense<0.000000e+00> : vector<8x512xf32>
    %36 = tpu.matmul %34, %35, %cst_23 {dimension_numbers = #tpu.dot_dimension_numbers<[1], [0], [0], [1], [0, 0, 1, 1], [], []>} : vector<8x4xf32>, vector<4x512xf32>, vector<8x512xf32> -> vector<8x512xf32>
    %37 = arith.addf %32, %36 : vector<8x512xf32>
    %c4 = arith.constant 4 : index
    %c0_24 = arith.constant 0 : index
    %c0_25 = arith.constant 0 : index
    %38 = vector.load %arg4[%c4, %c0_24, %c0_25] : memref<9x8x4xf32, #tpu.memory_space<vmem>>, vector<1x8x4xf32>
    %39 = vector.shape_cast %38 : vector<1x8x4xf32> to vector<8x4xf32>
    %40 = vector.extract_strided_slice %16 {offsets = [0, 35], sizes = [4, 512], strides = [1, 1]} : vector<4x582xf32> to vector<4x512xf32>
    %cst_26 = arith.constant dense<0.000000e+00> : vector<8x512xf32>
    %41 = tpu.matmul %39, %40, %cst_26 {dimension_numbers = #tpu.dot_dimension_numbers<[1], [0], [0], [1], [0, 0, 1, 1], [], []>} : vector<8x4xf32>, vector<4x512xf32>, vector<8x512xf32> -> vector<8x512xf32>
    %42 = arith.addf %37, %41 : vector<8x512xf32>
    %c5 = arith.constant 5 : index
    %c0_27 = arith.constant 0 : index
    %c0_28 = arith.constant 0 : index
    %43 = vector.load %arg4[%c5, %c0_27, %c0_28] : memref<9x8x4xf32, #tpu.memory_space<vmem>>, vector<1x8x4xf32>
    %44 = vector.shape_cast %43 : vector<1x8x4xf32> to vector<8x4xf32>
    %45 = vector.extract_strided_slice %16 {offsets = [0, 36], sizes = [4, 512], strides = [1, 1]} : vector<4x582xf32> to vector<4x512xf32>
    %cst_29 = arith.constant dense<0.000000e+00> : vector<8x512xf32>
    %46 = tpu.matmul %44, %45, %cst_29 {dimension_numbers = #tpu.dot_dimension_numbers<[1], [0], [0], [1], [0, 0, 1, 1], [], []>} : vector<8x4xf32>, vector<4x512xf32>, vector<8x512xf32> -> vector<8x512xf32>
    %47 = arith.addf %42, %46 : vector<8x512xf32>
    %c6 = arith.constant 6 : index
    %c0_30 = arith.constant 0 : index
    %c0_31 = arith.constant 0 : index
    %48 = vector.load %arg4[%c6, %c0_30, %c0_31] : memref<9x8x4xf32, #tpu.memory_space<vmem>>, vector<1x8x4xf32>
    %49 = vector.shape_cast %48 : vector<1x8x4xf32> to vector<8x4xf32>
    %50 = vector.extract_strided_slice %16 {offsets = [0, 68], sizes = [4, 512], strides = [1, 1]} : vector<4x582xf32> to vector<4x512xf32>
    %cst_32 = arith.constant dense<0.000000e+00> : vector<8x512xf32>
    %51 = tpu.matmul %49, %50, %cst_32 {dimension_numbers = #tpu.dot_dimension_numbers<[1], [0], [0], [1], [0, 0, 1, 1], [], []>} : vector<8x4xf32>, vector<4x512xf32>, vector<8x512xf32> -> vector<8x512xf32>
    %52 = arith.addf %47, %51 : vector<8x512xf32>
    %c7 = arith.constant 7 : index
    %c0_33 = arith.constant 0 : index
    %c0_34 = arith.constant 0 : index
    %53 = vector.load %arg4[%c7, %c0_33, %c0_34] : memref<9x8x4xf32, #tpu.memory_space<vmem>>, vector<1x8x4xf32>
    %54 = vector.shape_cast %53 : vector<1x8x4xf32> to vector<8x4xf32>
    %55 = vector.extract_strided_slice %16 {offsets = [0, 69], sizes = [4, 512], strides = [1, 1]} : vector<4x582xf32> to vector<4x512xf32>
    %cst_35 = arith.constant dense<0.000000e+00> : vector<8x512xf32>
    %56 = tpu.matmul %54, %55, %cst_35 {dimension_numbers = #tpu.dot_dimension_numbers<[1], [0], [0], [1], [0, 0, 1, 1], [], []>} : vector<8x4xf32>, vector<4x512xf32>, vector<8x512xf32> -> vector<8x512xf32>
    %57 = arith.addf %52, %56 : vector<8x512xf32>
    %c8 = arith.constant 8 : index
    %c0_36 = arith.constant 0 : index
    %c0_37 = arith.constant 0 : index
    %58 = vector.load %arg4[%c8, %c0_36, %c0_37] : memref<9x8x4xf32, #tpu.memory_space<vmem>>, vector<1x8x4xf32>
    %59 = vector.shape_cast %58 : vector<1x8x4xf32> to vector<8x4xf32>
    %60 = vector.extract_strided_slice %16 {offsets = [0, 70], sizes = [4, 512], strides = [1, 1]} : vector<4x582xf32> to vector<4x512xf32>
    %cst_38 = arith.constant dense<0.000000e+00> : vector<8x512xf32>
    %61 = tpu.matmul %59, %60, %cst_38 {dimension_numbers = #tpu.dot_dimension_numbers<[1], [0], [0], [1], [0, 0, 1, 1], [], []>} : vector<8x4xf32>, vector<4x512xf32>, vector<8x512xf32> -> vector<8x512xf32>
    %62 = arith.addf %57, %61 : vector<8x512xf32>
    %c0_39 = arith.constant 0 : index
    %c0_40 = arith.constant 0 : index
    %63 = vector.load %arg5[%c0_39, %c0_40] : memref<8x1xf32, #tpu.memory_space<vmem>>, vector<8x1xf32>
    %64 = vector.broadcast %63 : vector<8x1xf32> to vector<8x512xf32>
    %65 = arith.addf %62, %64 : vector<8x512xf32>
    %c0_41 = arith.constant 0 : index
    %c0_42 = arith.constant 0 : index
    %66 = vector.load %arg3[%c0_41, %c0_42] : memref<1x512xf32, #tpu.memory_space<vmem>>, vector<1x512xf32>
    %67 = vector.broadcast %66 : vector<1x512xf32> to vector<8x512xf32>
    %68 = arith.mulf %65, %67 : vector<8x512xf32>
    %c0_43 = arith.constant 0 : index
    %c0_44 = arith.constant 0 : index
    %69 = vector.load %arg8[%c0_43, %c0_44] : memref<8x512xf32, #tpu.memory_space<vmem>>, vector<8x512xf32>
    tpu.vector_store %arg8[%c0_43, %c0_44], %68 {strides = array<i32>} : memref<8x512xf32, #tpu.memory_space<vmem>>, vector<8x512xf32>,
    %c0_45 = arith.constant 0 : index
    %c0_46 = arith.constant 0 : index
    %70 = vector.load %arg9[%c0_45, %c0_46] : memref<8x1xf32, #tpu.memory_space<vmem>>, vector<8x1xf32>
    %cst_47 = arith.constant dense<0.000000e+00> : vector<8xf32>
    %71 = vector.multi_reduction <add>, %68, %cst_47 [1] : vector<8x512xf32> to vector<8xf32>
    %72 = vector.shape_cast %71 : vector<8xf32> to vector<8x1xf32>
    %73 = arith.addf %70, %72 : vector<8x1xf32>
    %c0_48 = arith.constant 0 : index
    %c0_49 = arith.constant 0 : index
    %74 = vector.load %arg9[%c0_48, %c0_49] : memref<8x1xf32, #tpu.memory_space<vmem>>, vector<8x1xf32>
    tpu.vector_store %arg9[%c0_48, %c0_49], %73 {strides = array<i32>} : memref<8x1xf32, #tpu.memory_space<vmem>>, vector<8x1xf32>,
    %c0_50 = arith.constant 0 : index
    %c0_51 = arith.constant 0 : index
    %75 = vector.load %arg10[%c0_50, %c0_51] : memref<8x1xf32, #tpu.memory_space<vmem>>, vector<8x1xf32>
    %76 = arith.mulf %68, %68 : vector<8x512xf32>
    %cst_52 = arith.constant dense<0.000000e+00> : vector<8xf32>
    %77 = vector.multi_reduction <add>, %76, %cst_52 [1] : vector<8x512xf32> to vector<8xf32>
    %78 = vector.shape_cast %77 : vector<8xf32> to vector<8x1xf32>
    %79 = arith.addf %75, %78 : vector<8x1xf32>
    %c0_53 = arith.constant 0 : index
    %c0_54 = arith.constant 0 : index
    %80 = vector.load %arg10[%c0_53, %c0_54] : memref<8x1xf32, #tpu.memory_space<vmem>>, vector<8x1xf32>
    tpu.vector_store %arg10[%c0_53, %c0_54], %79 {strides = array<i32>} : memref<8x1xf32, #tpu.memory_space<vmem>>, vector<8x1xf32>,
    return
  }
  func.func @transform_0(%arg0: i32) -> (i32, i32, i32) {
    %c0_i32 = arith.constant 0 : i32
    %c0_i32_0 = arith.constant 0 : i32
    %c0_i32_1 = arith.constant 0 : i32
    return %arg0, %c0_i32, %c0_i32_0 : i32, i32, i32
  }
  func.func @transform_1(%arg0: i32) -> (i32, i32, i32) {
    %c0_i32 = arith.constant 0 : i32
    %c0_i32_0 = arith.constant 0 : i32
    %c0_i32_1 = arith.constant 0 : i32
    return %arg0, %c0_i32, %c0_i32_0 : i32, i32, i32
  }
  func.func @transform_2(%arg0: i32) -> (i32, i32) {
    %c0_i32 = arith.constant 0 : i32
    %c0_i32_0 = arith.constant 0 : i32
    return %c0_i32, %arg0 : i32, i32
  }
  func.func @transform_3(%arg0: i32) -> (i32, i32, i32) {
    %c0_i32 = arith.constant 0 : i32
    %c0_i32_0 = arith.constant 0 : i32
    %c0_i32_1 = arith.constant 0 : i32
    %c0_i32_2 = arith.constant 0 : i32
    return %c0_i32, %c0_i32_0, %c0_i32_1 : i32, i32, i32
  }
  func.func @transform_4(%arg0: i32) -> (i32, i32) {
    %c0_i32 = arith.constant 0 : i32
    %c0_i32_0 = arith.constant 0 : i32
    %c0_i32_1 = arith.constant 0 : i32
    return %c0_i32, %c0_i32_0 : i32, i32
  }
  func.func @transform_5(%arg0: i32) -> (i32, i32) {
    %c0_i32 = arith.constant 0 : i32
    %c0_i32_0 = arith.constant 0 : i32
    %c0_i32_1 = arith.constant 0 : i32
    return %c0_i32, %c0_i32_0 : i32, i32
  }
  func.func @transform_6(%arg0: i32) -> (i32, i32) {
    %c0_i32 = arith.constant 0 : i32
    %c0_i32_0 = arith.constant 0 : i32
    %c0_i32_1 = arith.constant 0 : i32
    return %c0_i32, %c0_i32_0 : i32, i32
  }
  func.func @transform_7(%arg0: i32) -> (i32, i32) {
    %c0_i32 = arith.constant 0 : i32
    %c0_i32_0 = arith.constant 0 : i32
    return %c0_i32, %arg0 : i32, i32
  }
  func.func @transform_8(%arg0: i32) -> (i32, i32) {
    %c0_i32 = arith.constant 0 : i32
    %c0_i32_0 = arith.constant 0 : i32
    %c0_i32_1 = arith.constant 0 : i32
    return %c0_i32, %c0_i32_0 : i32, i32
  }
  func.func @transform_9(%arg0: i32) -> (i32, i32) {
    %c0_i32 = arith.constant 0 : i32
    %c0_i32_0 = arith.constant 0 : i32
    %c0_i32_1 = arith.constant 0 : i32
    return %c0_i32, %c0_i32_0 : i32, i32
  }
}

module attributes {stable_mosaic.version = 11 : i64} {
  func.func @conv2_add_kernel(%arg0: i32, %arg1: memref<1x8x582xf32, #tpu.memory_space<vmem>>, %arg2: memref<1x1x582xf32, #tpu.memory_space<vmem>>, %arg3: memref<9x8x8xf32, #tpu.memory_space<vmem>>, %arg4: memref<8x1xf32, #tpu.memory_space<vmem>>, %arg5: memref<8x1xf32, #tpu.memory_space<vmem>>, %arg6: memref<8x1xf32, #tpu.memory_space<vmem>>, %arg7: memref<8x512xf32, #tpu.memory_space<vmem>>, %arg8: memref<8x512xf32, #tpu.memory_space<vmem>>) attributes {dimension_semantics = [#tpu.dimension_semantics<parallel>], iteration_bounds = array<i64: 5>, scalar_prefetch = 0 : i64, scratch_operands = 0 : i64, tpu.core_type = #tpu.core_type<tc>, window_params = [{transform_indices = @transform_0, window_bounds = array<i64: 1, 8, 582>}, {transform_indices = @transform_1, window_bounds = array<i64: 1, 1, 582>}, {pipeline_mode = #tpu.pipeline_mode<synchronous>, transform_indices = @transform_2, window_bounds = array<i64: 9, 8, 8>}, {pipeline_mode = #tpu.pipeline_mode<synchronous>, transform_indices = @transform_3, window_bounds = array<i64: 8, 1>}, {pipeline_mode = #tpu.pipeline_mode<synchronous>, transform_indices = @transform_4, window_bounds = array<i64: 8, 1>}, {pipeline_mode = #tpu.pipeline_mode<synchronous>, transform_indices = @transform_5, window_bounds = array<i64: 8, 1>}, {transform_indices = @transform_6, window_bounds = array<i64: 8, 512>}, {transform_indices = @transform_7, window_bounds = array<i64: 8, 512>}]} {
    %c0 = arith.constant 0 : index
    %c0_0 = arith.constant 0 : index
    %c0_1 = arith.constant 0 : index
    %0 = vector.load %arg1[%c0, %c0_0, %c0_1] : memref<1x8x582xf32, #tpu.memory_space<vmem>>, vector<1x8x582xf32>
    %1 = vector.shape_cast %0 : vector<1x8x582xf32> to vector<8x582xf32>
    %c0_2 = arith.constant 0 : index
    %c0_3 = arith.constant 0 : index
    %2 = vector.load %arg5[%c0_2, %c0_3] : memref<8x1xf32, #tpu.memory_space<vmem>>, vector<8x1xf32>
    %3 = vector.broadcast %2 : vector<8x1xf32> to vector<8x582xf32>
    %4 = arith.mulf %1, %3 : vector<8x582xf32>
    %c0_4 = arith.constant 0 : index
    %c0_5 = arith.constant 0 : index
    %5 = vector.load %arg6[%c0_4, %c0_5] : memref<8x1xf32, #tpu.memory_space<vmem>>, vector<8x1xf32>
    %6 = vector.broadcast %5 : vector<8x1xf32> to vector<8x582xf32>
    %7 = arith.addf %4, %6 : vector<8x582xf32>
    %cst = arith.constant 0.000000e+00 : f32
    %8 = vector.broadcast %cst : f32 to vector<8x582xf32>
    %9 = arith.maximumf %7, %8 : vector<8x582xf32>
    %c0_6 = arith.constant 0 : index
    %c0_7 = arith.constant 0 : index
    %c0_8 = arith.constant 0 : index
    %10 = vector.load %arg2[%c0_6, %c0_7, %c0_8] : memref<1x1x582xf32, #tpu.memory_space<vmem>>, vector<1x1x582xf32>
    %11 = vector.shape_cast %10 : vector<1x1x582xf32> to vector<1x582xf32>
    %12 = vector.broadcast %11 : vector<1x582xf32> to vector<8x582xf32>
    %13 = arith.mulf %9, %12 : vector<8x582xf32>
    %cst_9 = arith.constant 0.000000e+00 : f32
    %14 = vector.broadcast %cst_9 : f32 to vector<8x512xf32>
    %c0_10 = arith.constant 0 : index
    %c0_11 = arith.constant 0 : index
    %c0_12 = arith.constant 0 : index
    %15 = vector.load %arg3[%c0_10, %c0_11, %c0_12] : memref<9x8x8xf32, #tpu.memory_space<vmem>>, vector<1x8x8xf32>
    %16 = vector.shape_cast %15 : vector<1x8x8xf32> to vector<8x8xf32>
    %17 = vector.extract_strided_slice %13 {offsets = [0, 0], sizes = [8, 512], strides = [1, 1]} : vector<8x582xf32> to vector<8x512xf32>
    %cst_13 = arith.constant dense<0.000000e+00> : vector<8x512xf32>
    %18 = tpu.matmul %16, %17, %cst_13 {dimension_numbers = #tpu.dot_dimension_numbers<[1], [0], [0], [1], [0, 0, 1, 1], [], []>} : vector<8x8xf32>, vector<8x512xf32>, vector<8x512xf32> -> vector<8x512xf32>
    %19 = arith.addf %14, %18 : vector<8x512xf32>
    %c1 = arith.constant 1 : index
    %c0_14 = arith.constant 0 : index
    %c0_15 = arith.constant 0 : index
    %20 = vector.load %arg3[%c1, %c0_14, %c0_15] : memref<9x8x8xf32, #tpu.memory_space<vmem>>, vector<1x8x8xf32>
    %21 = vector.shape_cast %20 : vector<1x8x8xf32> to vector<8x8xf32>
    %22 = vector.extract_strided_slice %13 {offsets = [0, 1], sizes = [8, 512], strides = [1, 1]} : vector<8x582xf32> to vector<8x512xf32>
    %cst_16 = arith.constant dense<0.000000e+00> : vector<8x512xf32>
    %23 = tpu.matmul %21, %22, %cst_16 {dimension_numbers = #tpu.dot_dimension_numbers<[1], [0], [0], [1], [0, 0, 1, 1], [], []>} : vector<8x8xf32>, vector<8x512xf32>, vector<8x512xf32> -> vector<8x512xf32>
    %24 = arith.addf %19, %23 : vector<8x512xf32>
    %c2 = arith.constant 2 : index
    %c0_17 = arith.constant 0 : index
    %c0_18 = arith.constant 0 : index
    %25 = vector.load %arg3[%c2, %c0_17, %c0_18] : memref<9x8x8xf32, #tpu.memory_space<vmem>>, vector<1x8x8xf32>
    %26 = vector.shape_cast %25 : vector<1x8x8xf32> to vector<8x8xf32>
    %27 = vector.extract_strided_slice %13 {offsets = [0, 2], sizes = [8, 512], strides = [1, 1]} : vector<8x582xf32> to vector<8x512xf32>
    %cst_19 = arith.constant dense<0.000000e+00> : vector<8x512xf32>
    %28 = tpu.matmul %26, %27, %cst_19 {dimension_numbers = #tpu.dot_dimension_numbers<[1], [0], [0], [1], [0, 0, 1, 1], [], []>} : vector<8x8xf32>, vector<8x512xf32>, vector<8x512xf32> -> vector<8x512xf32>
    %29 = arith.addf %24, %28 : vector<8x512xf32>
    %c3 = arith.constant 3 : index
    %c0_20 = arith.constant 0 : index
    %c0_21 = arith.constant 0 : index
    %30 = vector.load %arg3[%c3, %c0_20, %c0_21] : memref<9x8x8xf32, #tpu.memory_space<vmem>>, vector<1x8x8xf32>
    %31 = vector.shape_cast %30 : vector<1x8x8xf32> to vector<8x8xf32>
    %32 = vector.extract_strided_slice %13 {offsets = [0, 34], sizes = [8, 512], strides = [1, 1]} : vector<8x582xf32> to vector<8x512xf32>
    %cst_22 = arith.constant dense<0.000000e+00> : vector<8x512xf32>
    %33 = tpu.matmul %31, %32, %cst_22 {dimension_numbers = #tpu.dot_dimension_numbers<[1], [0], [0], [1], [0, 0, 1, 1], [], []>} : vector<8x8xf32>, vector<8x512xf32>, vector<8x512xf32> -> vector<8x512xf32>
    %34 = arith.addf %29, %33 : vector<8x512xf32>
    %c4 = arith.constant 4 : index
    %c0_23 = arith.constant 0 : index
    %c0_24 = arith.constant 0 : index
    %35 = vector.load %arg3[%c4, %c0_23, %c0_24] : memref<9x8x8xf32, #tpu.memory_space<vmem>>, vector<1x8x8xf32>
    %36 = vector.shape_cast %35 : vector<1x8x8xf32> to vector<8x8xf32>
    %37 = vector.extract_strided_slice %13 {offsets = [0, 35], sizes = [8, 512], strides = [1, 1]} : vector<8x582xf32> to vector<8x512xf32>
    %cst_25 = arith.constant dense<0.000000e+00> : vector<8x512xf32>
    %38 = tpu.matmul %36, %37, %cst_25 {dimension_numbers = #tpu.dot_dimension_numbers<[1], [0], [0], [1], [0, 0, 1, 1], [], []>} : vector<8x8xf32>, vector<8x512xf32>, vector<8x512xf32> -> vector<8x512xf32>
    %39 = arith.addf %34, %38 : vector<8x512xf32>
    %c5 = arith.constant 5 : index
    %c0_26 = arith.constant 0 : index
    %c0_27 = arith.constant 0 : index
    %40 = vector.load %arg3[%c5, %c0_26, %c0_27] : memref<9x8x8xf32, #tpu.memory_space<vmem>>, vector<1x8x8xf32>
    %41 = vector.shape_cast %40 : vector<1x8x8xf32> to vector<8x8xf32>
    %42 = vector.extract_strided_slice %13 {offsets = [0, 36], sizes = [8, 512], strides = [1, 1]} : vector<8x582xf32> to vector<8x512xf32>
    %cst_28 = arith.constant dense<0.000000e+00> : vector<8x512xf32>
    %43 = tpu.matmul %41, %42, %cst_28 {dimension_numbers = #tpu.dot_dimension_numbers<[1], [0], [0], [1], [0, 0, 1, 1], [], []>} : vector<8x8xf32>, vector<8x512xf32>, vector<8x512xf32> -> vector<8x512xf32>
    %44 = arith.addf %39, %43 : vector<8x512xf32>
    %c6 = arith.constant 6 : index
    %c0_29 = arith.constant 0 : index
    %c0_30 = arith.constant 0 : index
    %45 = vector.load %arg3[%c6, %c0_29, %c0_30] : memref<9x8x8xf32, #tpu.memory_space<vmem>>, vector<1x8x8xf32>
    %46 = vector.shape_cast %45 : vector<1x8x8xf32> to vector<8x8xf32>
    %47 = vector.extract_strided_slice %13 {offsets = [0, 68], sizes = [8, 512], strides = [1, 1]} : vector<8x582xf32> to vector<8x512xf32>
    %cst_31 = arith.constant dense<0.000000e+00> : vector<8x512xf32>
    %48 = tpu.matmul %46, %47, %cst_31 {dimension_numbers = #tpu.dot_dimension_numbers<[1], [0], [0], [1], [0, 0, 1, 1], [], []>} : vector<8x8xf32>, vector<8x512xf32>, vector<8x512xf32> -> vector<8x512xf32>
    %49 = arith.addf %44, %48 : vector<8x512xf32>
    %c7 = arith.constant 7 : index
    %c0_32 = arith.constant 0 : index
    %c0_33 = arith.constant 0 : index
    %50 = vector.load %arg3[%c7, %c0_32, %c0_33] : memref<9x8x8xf32, #tpu.memory_space<vmem>>, vector<1x8x8xf32>
    %51 = vector.shape_cast %50 : vector<1x8x8xf32> to vector<8x8xf32>
    %52 = vector.extract_strided_slice %13 {offsets = [0, 69], sizes = [8, 512], strides = [1, 1]} : vector<8x582xf32> to vector<8x512xf32>
    %cst_34 = arith.constant dense<0.000000e+00> : vector<8x512xf32>
    %53 = tpu.matmul %51, %52, %cst_34 {dimension_numbers = #tpu.dot_dimension_numbers<[1], [0], [0], [1], [0, 0, 1, 1], [], []>} : vector<8x8xf32>, vector<8x512xf32>, vector<8x512xf32> -> vector<8x512xf32>
    %54 = arith.addf %49, %53 : vector<8x512xf32>
    %c8 = arith.constant 8 : index
    %c0_35 = arith.constant 0 : index
    %c0_36 = arith.constant 0 : index
    %55 = vector.load %arg3[%c8, %c0_35, %c0_36] : memref<9x8x8xf32, #tpu.memory_space<vmem>>, vector<1x8x8xf32>
    %56 = vector.shape_cast %55 : vector<1x8x8xf32> to vector<8x8xf32>
    %57 = vector.extract_strided_slice %13 {offsets = [0, 70], sizes = [8, 512], strides = [1, 1]} : vector<8x582xf32> to vector<8x512xf32>
    %cst_37 = arith.constant dense<0.000000e+00> : vector<8x512xf32>
    %58 = tpu.matmul %56, %57, %cst_37 {dimension_numbers = #tpu.dot_dimension_numbers<[1], [0], [0], [1], [0, 0, 1, 1], [], []>} : vector<8x8xf32>, vector<8x512xf32>, vector<8x512xf32> -> vector<8x512xf32>
    %59 = arith.addf %54, %58 : vector<8x512xf32>
    %c0_38 = arith.constant 0 : index
    %c0_39 = arith.constant 0 : index
    %60 = vector.load %arg4[%c0_38, %c0_39] : memref<8x1xf32, #tpu.memory_space<vmem>>, vector<8x1xf32>
    %61 = vector.broadcast %60 : vector<8x1xf32> to vector<8x512xf32>
    %62 = arith.addf %59, %61 : vector<8x512xf32>
    %c0_40 = arith.constant 0 : index
    %c0_41 = arith.constant 0 : index
    %63 = vector.load %arg7[%c0_40, %c0_41] : memref<8x512xf32, #tpu.memory_space<vmem>>, vector<8x512xf32>
    %64 = arith.addf %62, %63 : vector<8x512xf32>
    %c0_42 = arith.constant 0 : index
    %c0_43 = arith.constant 0 : index
    %65 = vector.load %arg8[%c0_42, %c0_43] : memref<8x512xf32, #tpu.memory_space<vmem>>, vector<8x512xf32>
    tpu.vector_store %arg8[%c0_42, %c0_43], %64 {strides = array<i32>} : memref<8x512xf32, #tpu.memory_space<vmem>>, vector<8x512xf32>,
    return
  }
  func.func @transform_0(%arg0: i32) -> (i32, i32, i32) {
    %c0_i32 = arith.constant 0 : i32
    %c0_i32_0 = arith.constant 0 : i32
    %c0_i32_1 = arith.constant 0 : i32
    return %arg0, %c0_i32, %c0_i32_0 : i32, i32, i32
  }
  func.func @transform_1(%arg0: i32) -> (i32, i32, i32) {
    %c0_i32 = arith.constant 0 : i32
    %c0_i32_0 = arith.constant 0 : i32
    %c0_i32_1 = arith.constant 0 : i32
    return %arg0, %c0_i32, %c0_i32_0 : i32, i32, i32
  }
  func.func @transform_2(%arg0: i32) -> (i32, i32, i32) {
    %c0_i32 = arith.constant 0 : i32
    %c0_i32_0 = arith.constant 0 : i32
    %c0_i32_1 = arith.constant 0 : i32
    %c0_i32_2 = arith.constant 0 : i32
    return %c0_i32, %c0_i32_0, %c0_i32_1 : i32, i32, i32
  }
  func.func @transform_3(%arg0: i32) -> (i32, i32) {
    %c0_i32 = arith.constant 0 : i32
    %c0_i32_0 = arith.constant 0 : i32
    %c0_i32_1 = arith.constant 0 : i32
    return %c0_i32, %c0_i32_0 : i32, i32
  }
  func.func @transform_4(%arg0: i32) -> (i32, i32) {
    %c0_i32 = arith.constant 0 : i32
    %c0_i32_0 = arith.constant 0 : i32
    %c0_i32_1 = arith.constant 0 : i32
    return %c0_i32, %c0_i32_0 : i32, i32
  }
  func.func @transform_5(%arg0: i32) -> (i32, i32) {
    %c0_i32 = arith.constant 0 : i32
    %c0_i32_0 = arith.constant 0 : i32
    %c0_i32_1 = arith.constant 0 : i32
    return %c0_i32, %c0_i32_0 : i32, i32
  }
  func.func @transform_6(%arg0: i32) -> (i32, i32) {
    %c0_i32 = arith.constant 0 : i32
    %c0_i32_0 = arith.constant 0 : i32
    return %c0_i32, %arg0 : i32, i32
  }
  func.func @transform_7(%arg0: i32) -> (i32, i32) {
    %c0_i32 = arith.constant 0 : i32
    %c0_i32_0 = arith.constant 0 : i32
    return %c0_i32, %arg0 : i32, i32
  }
}

</mosaic_0001>

<bundles_post_ra>
// kernel: gen_block_forward.3
= control target key start
LH: loop header
LB: loop body
LE: loop exit
PB: predicated region body
PF: predicated region fallthrough
CT: control target
= control target key end

     0   :  { %vm41_vm0 = vcmask 1043456   ;;  %v255_v2 = vmov 0.0   ;;  %vm21_vm1 = vcmask 3072   ;;  %v256_v6 = vmov 0   ;;  %s345_s0 = inlined_call_operand.vmem [shape: f32[4,512], index: 0, kind: input, shape index: {}]   ;;  %s346_s1 = inlined_call_operand.vmem [shape: f32[8,4], index: 1, kind: input, shape index: {}]   ;;  %s347_s2 = inlined_call_operand.vmem [shape: f32[8,1], index: 2, kind: input, shape index: {}]   ;;  %s348_s4 = inlined_call_operand.vmem [shape: f32[4,1], index: 4, kind: output, shape index: {1}]   ;;  %s349_s5 = inlined_call_operand.vmem [shape: f32[4,1], index: 5, kind: output, shape index: {2}]   ;;  %s350_s3 = inlined_call_operand.vmem [shape: f32[8,512], index: 3, kind: output, shape index: {0}]  }
   0x1   :  { %v24_v0 = vld [vmem:[%s345_s0] sm:$0xff]  ;;  %v25_v1 = vld [vmem:[%s345_s0 + $0x8] sm:$0xff]  ;;  %114 = vmatprep.mubr.f32.mxu0 %v255_v2  ;;  %185 = vmatprep.mubr.f32.mxu1 %v255_v2  ;;  %22 = vst.msk [vmem:[%s348_s4] sm:$0xf] %vm21_vm1, %v255_v2  ;;  %vm37_vm2 = vcmask 31744  }
   0x2   :  { %v35_v3 = vcombine.high %v24_v0, %v24_v0  ;;  %v36_v4 = vcombine.high %v25_v1, %v25_v1  ;;  %v199_v5 = vsel %vm41_vm0, %v24_v0, 0.0  ;;  %251 = vset.pattern.permute.xlu1 %v256_v6  ;;  %v27_v7 = vld [vmem:[%s347_s2] sm:$0xff]  ;;  %252 = vset.pattern.permute.xlu0 %v256_v6  ;;  %v212_v9 = vmul.f32 %v24_v0, %v24_v0 }
   0x3   :  { %v26_v8 = vld [vmem:[%s346_s1] sm:$0xff]  ;;  %v213_v10 = vmul.f32 %v25_v1, %v25_v1  ;;  %30 = vperm.xlu1 %251, %v27_v7   ;;  %v202_v12 = vsel %vm41_vm0, %v25_v1, 0.0  ;;  %23 = vst.msk [vmem:[%s349_s5] sm:$0xf] %vm21_vm1, %v255_v2 }
   0x4   :  { %243 = vmatprep.subr.msk.mxu0 %vm41_vm0, %v35_v3  ;;  %v200_v11 = vsel %vm41_vm0, %v35_v3, 0.0  ;;  %246 = vmatprep.subr.msk.mxu1 %vm41_vm0, %v36_v4  ;;  %v216_v14 = vcombine.high %v212_v9, %v212_v9  ;;  %v220_v16 = vsel %vm41_vm0, %v212_v9, 0.0  ;;  %v204_v17 = vsel %vm41_vm0, %v36_v4, 0.0 }
   0x5   :  { %244 = vmatpush1.msk.msra.mxu0 %vm41_vm0, %v24_v0  ;;  %247 = vmatpush1.msk.msra.mxu1 %vm41_vm0, %v25_v1  ;;  %v201_v13 = vadd.f32 %v200_v11, %v199_v5  ;;  %v217_v15 = vcombine.high %v213_v10, %v213_v10  ;;  %v223_v20 = vsel %vm41_vm0, %v213_v10, 0.0 }
   0x6   :  { %245 = vmatmul.mubr.msk.f32.vlgmr.msra.gmra.mrb[0].mxu0 %vm37_vm2, %v26_v8  ;;  %248 = vmatmul.mubr.msk.f32.vlgmr.msra.gmra.mrb[0].mxu1 %vm37_vm2, %v26_v8  ;;  %v221_v19 = vsel %vm41_vm0, %v216_v14, 0.0 }
   0x7   :  { %v203_v18 = vadd.f32 %v202_v12, %v201_v13  ;;  %v222_v21 = vadd.f32 %v221_v19, %v220_v16  ;;  %v225_v23 = vsel %vm41_vm0, %v217_v15, 0.0 }
   0x8   :  { %v196_v26 = vld [vmem:[%s348_s4] sm:$0xf] }
   0x9   :  { %v205_v22 = vadd.f32 %v204_v17, %v203_v18  ;;  %v224_v24 = vadd.f32 %v223_v20, %v222_v21 }
   0xa   :  { %v211_v29 = vld [vmem:[%s349_s5] sm:$0xf] }
   0xb   :  { %206 = vadd.xlane.f32.xlu0 %v205_v22  ;;  %v226_v25 = vadd.f32 %v225_v23, %v224_v24 }
   0xf   :  { %227 = vadd.xlane.f32.xlu0 %v226_v25 }
  0x82   :  { %v31_v32 = vpop.permute.xlu1 %30 }
  0x98   :  { %v207_v27 = vpop.xlane.xlu0 %206 }
  0x99   :  { %v208_v28 = vadd.f32 %v207_v27, %v196_v26 }
  0x9b   :  { %210 = vst.msk [vmem:[%s348_s4] sm:$0xf] %vm21_vm1, %v208_v28 }
  0x9c   :  { %v228_v30 = vpop.xlane.xlu0 %227 }
  0x9d   :  { %v229_v31 = vadd.f32 %v228_v30, %v211_v29 }
  0x9f   :  { %230 = vst.msk [vmem:[%s349_s5] sm:$0xf] %vm21_vm1, %v229_v31 }
  0xd9   :  { %v116_v33 = vpop.f32.mrb[0].mxu0  ;;  %v187_v34 = vpop.f32.mrb[0].mxu1 }
  0xda   :  { %v117_v35 = vadd.f32 %v116_v33, %v31_v32  ;;  %v188_v36 = vadd.f32 %v187_v34, %v31_v32  ;;  %v189_v37 = vpop.f32.mrb[1].mxu1  ;;  %v118_v38 = vpop.f32.mrb[1].mxu0 }
  0xdb   :  { %v190_v39 = vadd.f32 %v189_v37, %v31_v32  ;;  %v119_v40 = vadd.f32 %v118_v38, %v31_v32 }
  0xdc   :  { %192 = vst [vmem:[%s350_s3] sm:$0xff] %v117_v35  ;;  %194 = vst [vmem:[%s350_s3 + $0x10] sm:$0xff] %v188_v36 }
  0xdd   :  { %195 = vst [vmem:[%s350_s3 + $0x18] sm:$0xff] %v190_v39  ;;  %193 = vst [vmem:[%s350_s3 + $0x8] sm:$0xff] %v119_v40 }

// kernel: gen_block_forward.4
= control target key start
LH: loop header
LB: loop body
LE: loop exit
PB: predicated region body
PF: predicated region fallthrough
CT: control target
= control target key end

     0   :  { %s2338_s30 = smov 0   ;;  %s2592_s0 = inlined_call_operand.vmem [shape: f32[5,4,582], index: 0, kind: input, shape index: {}]   ;;  %s2593_s1 = inlined_call_operand.vmem [shape: f32[5,1,582], index: 1, kind: input, shape index: {}]   ;;  %s2594_s2 = inlined_call_operand.vmem [shape: f32[1,2560], index: 2, kind: input, shape index: {}]   ;;  %s2595_s3 = inlined_call_operand.vmem [shape: f32[9,8,4], index: 3, kind: input, shape index: {}]   ;;  %s2596_s4 = inlined_call_operand.vmem [shape: f32[8,1], index: 4, kind: input, shape index: {}]   ;;  %s2597_s5 = inlined_call_operand.vmem [shape: f32[4,1], index: 5, kind: input, shape index: {}]   ;;  %s2598_s6 = inlined_call_operand.vmem [shape: f32[4,1], index: 6, kind: input, shape index: {}]   ;;  %s2599_s7 = inlined_call_operand.vmem [shape: f32[8,2560], index: 7, kind: output, shape index: {0}]   ;;  %s2600_s8 = inlined_call_operand.vmem [shape: f32[8,1], index: 8, kind: output, shape index: {1}]   ;;  %s2601_s9 = inlined_call_operand.vmem [shape: f32[8,1], index: 9, kind: output, shape index: {2}]  }
   0x1 LB: > { %s2139_s10 = sadd.s32 4294967295, %s2274_s30   ;;  %p2143_p0 = scmp.ge.s32.totalorder %s2274_s30, 1  ;;  %s2274_s30 = sphi %s2338_s30, %s20_s30  }
   0x2   : > { %p301_p1 = scmp.lt.s32.totalorder %s2274_s30, 6 }
   0x4   : > { %p302_p2 = pnand %p2143_p0, %p301_p1 }
   0x5   : > { %p345_p3 = scmp.lt.s32.totalorder (!%p302_p2), %s2139_s10, 4  ;;  %s2145_s11 = sshll.u32 (!%p302_p2), %s2139_s10, 2 }
   0x6   : > { %305 = sbr.rel (%p302_p2) target bundleno = 728 (0x2d8), region = 48  ;;  %p355_p4 = scmp.lt.s32.totalorder (!%p302_p2), %s2145_s11, 19 }
   0x7   : > { %p2148_p5 = scmp.ne.s32.totalorder (!%p302_p2), %s2139_s10, 0 }
   0xd   : > { %s346_s12 = scalar_select %p345_p3, %s2139_s10, 4 }
   0xe   : > { %s2603_s11 = smov (!%p355_p4, %s2145_s11), 19  ;;  %368 = sbr.rel (%p2148_p5) target bundleno = 21 (0x15), region = 52 }
   0xf   : > { %s2245_s13 = smul.u32 20, %s346_s12  ;;  %s357_s17 = scalar_lea.vmem %s2594_s2, %s2603_s11  ;;  %vm369_vm0 = vcmask (!%p2148_p5), 7168   ;;  %v2276_v0 = vmov (!%p2148_p5), 0.0  }
  0x10   : > { %s2246_s14 = smul.u32 5, %s346_s12  ;;  %s2147_s21 = sshll.u32 %s2603_s11, 3  ;;  %370 = vst.msk [vmem:[%s2600_s8] sm:$0xff] (!%p2148_p5), %vm369_vm0, %v2276_v0  ;;  %371 = vst.msk [vmem:[%s2601_s9] sm:$0xff] (!%p2148_p5), %vm369_vm0, %v2276_v0 }
  0x11   : > { %s2355_s20 = scalar_lea.vmem %s2592_s0, %s2245_s13  ;;  %s2364_s27 = scalar_lea.vmem %s2599_s7, %s2147_s21 }
  0x12   : > { %s353_s24 = scalar_lea.vmem %s2593_s1, %s2246_s14 }
  0x15 PF: > { %v375_v1 = vld [vmem:[%s2597_s5] sm:$0xf]  ;;  %v2277_v2 = vmov 0   ;;  %v2278_v4 = vmov 839922192   ;;  %v383_v6 = vlaneseq  ;;  %v373_v18 = vld [vmem:[%s2355_s20 + $0x8] sm:$0xff] }
  0x16   : > { %2267 = vset.pattern.permute.xlu0 %v2277_v2  ;;  %v391_v3 = vld [vmem:[%s2598_s6] sm:$0xf]  ;;  %v381_v5 = vunpack.c.l.s4 %v2278_v4  ;;  %v374_v19 = vld [vmem:[%s2355_s20 + $0x10] sm:$0xf]  ;;  %s2279_s18 = smov 127   ;;  %v2280_v41 = vmov 0.0  }
  0x17   : > { %378 = vperm.xlu0 %2267, %v375_v1   ;;  %v2378_v8 = vshrl.u32 %v383_v6, 7  ;;  %v410_v12 = vld [vmem:[%s353_s24] sm:$0x1f]  ;;  %540 = vmatprep.mubr.f32.mxu0 %v2280_v41  ;;  %s2281_s19 = smov 126   ;;  %s2283_s21 = smov 93   ;;  %vm458_vm1 = vcmask 1039360  }
  0x18   : > { %v382_v7 = vunpack.c.0.s8 %v381_v5  ;;  %v372_v17 = vld [vmem:[%s2355_s20] sm:$0xff]  ;;  %611 = vmatprep.mubr.f32.mxu1 %v2280_v41  ;;  %s2282_s20 = smov 94   ;;  %s2284_s22 = smov 92   ;;  %vm467_vm2 = vcmask 1043456   ;;  %v2149_v56 = vld [vmem:[%s2595_s3 + $0x8] sm:$0xff]  ;;  %vm463_vm3 = vcmask 31744  }
  0x19   : > { %v414_v10 = vsub.s32 0, %v2378_v8  ;;  %v418_v11 = vsub.s32 1, %v2378_v8  ;;  %v422_v13 = vsub.s32 2, %v2378_v8  ;;  %v426_v14 = vsub.s32 3, %v2378_v8  ;;  %s2285_s23 = smov 60   ;;  %s2286_s24 = smov 59  }
  0x1a   : > { %v385_v9 = vsub.s32 %v382_v7, %v2378_v8  ;;  %v430_v29 = vsub.s32 4, %v2378_v8  ;;  %s2287_s25 = smov 58   ;;  %v1989_v45 = vld [vmem:[%s2596_s4] sm:$0xff]  ;;  %vm783_vm4 = vcmask 1031168   ;;  %vm957_vm5 = vcmask 769024  }
  0x1b   : > { %394 = vperm.xlu0 %2267, %v391_v3   ;;  %v415_v20 = vrot.slane %v410_v12, %v414_v10  ;;  %v419_v21 = vrot.slane %v410_v12, %v418_v11  ;;  %v423_v22 = vrot.slane %v410_v12, %v422_v13  ;;  %v427_v23 = vrot.slane %v410_v12, %v426_v14  ;;  %v440_v63 = vld [vmem:[%s2595_s3] sm:$0xff] }
  0x1c   : > { %v431_v37 = vrot.slane %v410_v12, %v430_v29  ;;  %vm1131_vm6 = vcmask 760832   ;;  %vm1305_vm7 = vcmask 752640   ;;  %vm1479_vm8 = vcmask 490496  }
  0x1d   : > { %v433_v30 = vcombine.low %v415_v20, %v419_v21  ;;  %v434_v31 = vcombine.low %v423_v22, %v427_v23  ;;  %v2169_v20 = vld [vmem:[%s2595_s3 + $0x18] sm:$0xff]  ;;  %vm1653_vm9 = vcmask 482304   ;;  %vm1827_vm10 = vcmask 474112  }
  0x1e   : > { %vm2036_vm11 = vcmask 7168  }
  0x96   : > { %v379_v15 = vpop.permute.xlu0 %378 }
  0x97   : > { %v386_v16 = vrot.slane %v379_v15, %v385_v9 }
  0x99   : > { %v388_v25 = vmul.f32 %v386_v16, %v372_v17  ;;  %v389_v26 = vmul.f32 %v386_v16, %v373_v18  ;;  %v390_v27 = vmul.f32 %v386_v16, %v374_v19 }
  0x9a   : > { %v395_v24 = vpop.permute.xlu0 %394 }
  0x9b   : > { %v402_v28 = vrot.slane %v395_v24, %v385_v9  ;;  %v2162_v9 = vld [vmem:[%s2595_s3 + $0x10] sm:$0xff] }
  0x9d   : > { %v404_v32 = vadd.f32 %v402_v28, %v388_v25  ;;  %v405_v33 = vadd.f32 %v402_v28, %v389_v26  ;;  %v406_v34 = vadd.f32 %v402_v28, %v390_v27 }
  0x9f   : > { %v407_v35 = vmax.f32 %v404_v32, 0.0  ;;  %v408_v36 = vmax.f32 %v405_v33, 0.0  ;;  %v409_v38 = vmax.f32 %v406_v34, 0.0 }
  0xa1   : > { %v2397_v39 = vmul.f32 %v433_v30, %v407_v35  ;;  %v2399_v40 = vmul.f32 %v434_v31, %v408_v36  ;;  %v439_v42 = vmul.f32 %v431_v37, %v409_v38  ;;  %v2176_v31 = vld [vmem:[%s2595_s3 + $0x20] sm:$0xff]  ;;  %v2183_v38 = vld [vmem:[%s2595_s3 + $0x28] sm:$0xff] }
  0xa3   : > { %452 = vrot.lane.b32.xlu1 %v2399_v40, %s2279_s18  ;;  %448 = vrot.lane.b32.xlu0 %v2397_v39, %s2279_s18  ;;  %v446_v43 = vcombine.high %v2397_v39, %v2397_v39  ;;  %v2412_v44 = vcombine.high %v2399_v40, %v2399_v40 }
  0xa7   : > { %773 = vrot.lane.b32.xlu1 %v2397_v39, %s2281_s19  ;;  %456 = vrot.lane.b32.xlu0 %v439_v42, %s2279_s18 }
  0xab   : > { %781 = vrot.lane.b32.xlu1 %v439_v42, %s2281_s19  ;;  %777 = vrot.lane.b32.xlu0 %v2399_v40, %s2281_s19 }
  0xaf   : > { %947 = vrot.lane.b32.xlu0 %v2397_v39, %s2282_s20  ;;  %450 = vrot.lane.b32.xlu1 %v446_v43, %s2279_s18 }
  0xb3   : > { %955 = vrot.lane.b32.xlu0 %v439_v42, %s2282_s20  ;;  %454 = vrot.lane.b32.xlu1 %v2412_v44, %s2279_s18 }
  0xb7   : > { %1125 = vrot.lane.b32.xlu0 %v2399_v40, %s2283_s21  ;;  %951 = vrot.lane.b32.xlu1 %v2399_v40, %s2282_s20 }
  0xbb   : > { %779 = vrot.lane.b32.xlu0 %v2412_v44, %s2281_s19  ;;  %1121 = vrot.lane.b32.xlu1 %v2397_v39, %s2283_s21 }
  0xbf   : > { %949 = vrot.lane.b32.xlu0 %v446_v43, %s2282_s20  ;;  %775 = vrot.lane.b32.xlu1 %v446_v43, %s2281_s19 }
  0xc3   : > { %1295 = vrot.lane.b32.xlu0 %v2397_v39, %s2284_s22  ;;  %1129 = vrot.lane.b32.xlu1 %v439_v42, %s2283_s21 }
  0xc7   : > { %1303 = vrot.lane.b32.xlu0 %v439_v42, %s2284_s22  ;;  %1299 = vrot.lane.b32.xlu1 %v2399_v40, %s2284_s22 }
  0xcb   : > { %1127 = vrot.lane.b32.xlu0 %v2412_v44, %s2283_s21  ;;  %953 = vrot.lane.b32.xlu1 %v2412_v44, %s2282_s20 }
  0xcf   : > { %1297 = vrot.lane.b32.xlu0 %v446_v43, %s2284_s22  ;;  %1123 = vrot.lane.b32.xlu1 %v446_v43, %s2283_s21 }
  0xd3   : > { %1473 = vrot.lane.b32.xlu0 %v2399_v40, %s2285_s23  ;;  %1469 = vrot.lane.b32.xlu1 %v2397_v39, %s2285_s23 }
  0xd7   : > { %1643 = vrot.lane.b32.xlu0 %v2397_v39, %s2286_s24  ;;  %1477 = vrot.lane.b32.xlu1 %v439_v42, %s2285_s23 }
  0xdb   : > { %1475 = vrot.lane.b32.xlu0 %v2412_v44, %s2285_s23  ;;  %1301 = vrot.lane.b32.xlu1 %v2412_v44, %s2284_s22 }
  0xdf   : > { %1645 = vrot.lane.b32.xlu0 %v446_v43, %s2286_s24  ;;  %1471 = vrot.lane.b32.xlu1 %v446_v43, %s2285_s23 }
  0xe3   : > { %1651 = vrot.lane.b32.xlu0 %v439_v42, %s2286_s24  ;;  %1647 = vrot.lane.b32.xlu1 %v2399_v40, %s2286_s24 }
  0xe7   : > { %1821 = vrot.lane.b32.xlu0 %v2399_v40, %s2287_s25  ;;  %1817 = vrot.lane.b32.xlu1 %v2397_v39, %s2287_s25 }
  0xeb   : > { %1823 = vrot.lane.b32.xlu0 %v2412_v44, %s2287_s25  ;;  %1649 = vrot.lane.b32.xlu1 %v2412_v44, %s2286_s24 }
  0xef   : > { %1992 = vperm.xlu0 %2267, %v1989_v45   ;;  %1819 = vrot.lane.b32.xlu1 %v446_v43, %s2287_s25 }
  0xf3   : > { %1825 = vrot.lane.b32.xlu1 %v439_v42, %s2287_s25 }
 0x115   : > { %v453_v46 = vpop.permute.xlu1 %452  ;;  %v449_v47 = vpop.permute.xlu0 %448 }
 0x119   : > { %v774_v48 = vpop.permute.xlu1 %773  ;;  %v457_v49 = vpop.permute.xlu0 %456 }
 0x11d   : > { %v782_v50 = vpop.permute.xlu1 %781  ;;  %v778_v51 = vpop.permute.xlu0 %777 }
 0x121   : > { %v948_v52 = vpop.permute.xlu0 %947  ;;  %v451_v53 = vpop.permute.xlu1 %450 }
 0x122   : > { %v460_v54 = vsel %vm458_vm1, %v451_v53, %v453_v46  ;;  %v459_v55 = vsel %vm458_vm1, %v449_v47, %v451_v53 }
 0x123   : > { %2150 = vmatprep.subr.msk.mxu0 %vm467_vm2, %v460_v54 }
 0x124   : > { %2151 = vmatpush1.msk.msra.mxu0 %vm467_vm2, %v459_v55 }
 0x125   : > { %v956_v57 = vpop.permute.xlu0 %955  ;;  %2152 = vmatmul.mubr.msk.f32.vlgmr.msra.gmra.mrb[0].mxu0 %vm463_vm3, %v2149_v56  ;;  %2156 = vmatprep.subr.msk.mxu0 %vm467_vm2, %v446_v43  ;;  %v455_v58 = vpop.permute.xlu1 %454 }
 0x126   : > { %2157 = vmatpush1.msk.msra.mxu0 %vm467_vm2, %v2397_v39  ;;  %v462_v59 = vsel %vm458_vm1, %v455_v58, %v457_v49  ;;  %v461_v60 = vsel %vm458_vm1, %v453_v46, %v455_v58  ;;  %693 = vmatprep.mubr.f32.mxu0 %v2280_v41 }
 0x127   : > { %2153 = vmatprep.subr.msk.mxu1 %vm467_vm2, %v462_v59 }
 0x128   : > { %2154 = vmatpush1.msk.msra.mxu1 %vm467_vm2, %v461_v60 }
 0x129   : > { %v1126_v61 = vpop.permute.xlu0 %1125  ;;  %2155 = vmatmul.mubr.msk.f32.vlgmr.msra.gmra.mrb[0].mxu1 %vm463_vm3, %v2149_v56  ;;  %2159 = vmatprep.subr.msk.mxu1 %vm467_vm2, %v2412_v44  ;;  %v952_v62 = vpop.permute.xlu1 %951  ;;  %v2197_v56 = vld [vmem:[%s2595_s3 + $0x38] sm:$0xff] }
 0x12a   : > { %2160 = vmatpush1.msk.msra.mxu1 %vm467_vm2, %v2399_v40  ;;  %764 = vmatprep.mubr.f32.mxu1 %v2280_v41 }
 0x12d   : > { %v780_v0 = vpop.permute.xlu0 %779  ;;  %2158 = vmatmul.mubr.msk.f32.vlgmr.msra.gmra.mrb[0].mxu0 %vm463_vm3, %v440_v63  ;;  %v1122_v1 = vpop.permute.xlu1 %1121 }
 0x12e   : > { %v787_v2 = vsel %vm783_vm4, %v780_v0, %v782_v50  ;;  %863 = vmatprep.mubr.f32.mxu0 %v2280_v41  ;;  %v786_v3 = vsel %vm783_vm4, %v778_v51, %v780_v0  ;;  %v2190_v50 = vld [vmem:[%s2595_s3 + $0x30] sm:$0xff]  ;;  %v2204_v0 = vld [vmem:[%s2595_s3 + $0x40] sm:$0xff] }
 0x12f   : > { %2166 = vmatprep.subr.msk.mxu1 %vm467_vm2, %v787_v2 }
 0x131   : > { %v950_v4 = vpop.permute.xlu0 %949  ;;  %2161 = vmatmul.mubr.msk.f32.vlgmr.msra.gmra.mrb[0].mxu1 %vm463_vm3, %v440_v63  ;;  %v776_v5 = vpop.permute.xlu1 %775 }
 0x132   : > { %2167 = vmatpush1.msk.msra.mxu1 %vm467_vm2, %v786_v3  ;;  %v784_v6 = vsel %vm783_vm4, %v774_v48, %v776_v5  ;;  %v785_v7 = vsel %vm783_vm4, %v776_v5, %v778_v51  ;;  %934 = vmatprep.mubr.f32.mxu1 %v2280_v41  ;;  %v959_v12 = vsel %vm957_vm5, %v950_v4, %v952_v62 }
 0x133   : > { %2163 = vmatprep.subr.msk.mxu0 %vm467_vm2, %v785_v7  ;;  %v958_v15 = vsel %vm957_vm5, %v948_v52, %v950_v4 }
 0x134   : > { %2164 = vmatpush1.msk.msra.mxu0 %vm467_vm2, %v784_v6 }
 0x135   : > { %v1296_v16 = vpop.permute.xlu0 %1295  ;;  %2165 = vmatmul.mubr.msk.f32.vlgmr.msra.gmra.mrb[0].mxu0 %vm463_vm3, %v2162_v9  ;;  %2170 = vmatprep.subr.msk.mxu0 %vm467_vm2, %v959_v12  ;;  %v1130_v17 = vpop.permute.xlu1 %1129 }
 0x136   : > { %2171 = vmatpush1.msk.msra.mxu0 %vm467_vm2, %v958_v15  ;;  %1037 = vmatprep.mubr.f32.mxu0 %v2280_v41 }
 0x139   : > { %v1304_v18 = vpop.permute.xlu0 %1303  ;;  %2168 = vmatmul.mubr.msk.f32.vlgmr.msra.gmra.mrb[0].mxu1 %vm463_vm3, %v2162_v9  ;;  %v1300_v19 = vpop.permute.xlu1 %1299 }
 0x13a   : > { %1108 = vmatprep.mubr.f32.mxu1 %v2280_v41 }
 0x13d   : > { %v1128_v21 = vpop.permute.xlu0 %1127  ;;  %2172 = vmatmul.mubr.msk.f32.vlgmr.msra.gmra.mrb[0].mxu0 %vm463_vm3, %v2169_v20  ;;  %v954_v22 = vpop.permute.xlu1 %953 }
 0x13e   : > { %v960_v23 = vsel %vm957_vm5, %v952_v62, %v954_v22  ;;  %v961_v24 = vsel %vm957_vm5, %v954_v22, %v956_v57  ;;  %1211 = vmatprep.mubr.f32.mxu0 %v2280_v41  ;;  %v1135_v25 = vsel %vm1131_vm6, %v1128_v21, %v1130_v17  ;;  %v1134_v26 = vsel %vm1131_vm6, %v1126_v61, %v1128_v21 }
 0x13f   : > { %2173 = vmatprep.subr.msk.mxu1 %vm467_vm2, %v961_v24 }
 0x140   : > { %2174 = vmatpush1.msk.msra.mxu1 %vm467_vm2, %v960_v23 }
 0x141   : > { %v1298_v27 = vpop.permute.xlu0 %1297  ;;  %2175 = vmatmul.mubr.msk.f32.vlgmr.msra.gmra.mrb[0].mxu1 %vm463_vm3, %v2169_v20  ;;  %2180 = vmatprep.subr.msk.mxu1 %vm467_vm2, %v1135_v25  ;;  %v1124_v28 = vpop.permute.xlu1 %1123 }
 0x142   : > { %v1132_v29 = vsel %vm1131_vm6, %v1122_v1, %v1124_v28  ;;  %v1133_v30 = vsel %vm1131_vm6, %v1124_v28, %v1126_v61  ;;  %2181 = vmatpush1.msk.msra.mxu1 %vm467_vm2, %v1134_v26  ;;  %1282 = vmatprep.mubr.f32.mxu1 %v2280_v41  ;;  %v1307_v32 = vsel %vm1305_vm7, %v1298_v27, %v1300_v19 }
 0x143   : > { %2177 = vmatprep.subr.msk.mxu0 %vm467_vm2, %v1133_v30  ;;  %v1306_v33 = vsel %vm1305_vm7, %v1296_v16, %v1298_v27 }
 0x144   : > { %2178 = vmatpush1.msk.msra.mxu0 %vm467_vm2, %v1132_v29 }
 0x145   : > { %v1474_v34 = vpop.permute.xlu0 %1473  ;;  %2179 = vmatmul.mubr.msk.f32.vlgmr.msra.gmra.mrb[0].mxu0 %vm463_vm3, %v2176_v31  ;;  %2184 = vmatprep.subr.msk.mxu0 %vm467_vm2, %v1307_v32  ;;  %v1470_v35 = vpop.permute.xlu1 %1469  ;;  %v2029_v32 = vld [vmem:[%s2600_s8] sm:$0xff] }
 0x146   : > { %2185 = vmatpush1.msk.msra.mxu0 %vm467_vm2, %v1306_v33  ;;  %1385 = vmatprep.mubr.f32.mxu0 %v2280_v41 }
 0x149   : > { %v1644_v36 = vpop.permute.xlu0 %1643  ;;  %2182 = vmatmul.mubr.msk.f32.vlgmr.msra.gmra.mrb[0].mxu1 %vm463_vm3, %v2176_v31  ;;  %v1478_v37 = vpop.permute.xlu1 %1477 }
 0x14a   : > { %1456 = vmatprep.mubr.f32.mxu1 %v2280_v41 }
 0x14d   : > { %v1476_v39 = vpop.permute.xlu0 %1475  ;;  %2186 = vmatmul.mubr.msk.f32.vlgmr.msra.gmra.mrb[0].mxu0 %vm463_vm3, %v2183_v38  ;;  %v1302_v40 = vpop.permute.xlu1 %1301 }
 0x14e   : > { %v1308_v42 = vsel %vm1305_vm7, %v1300_v19, %v1302_v40  ;;  %v1309_v43 = vsel %vm1305_vm7, %v1302_v40, %v1304_v18  ;;  %1559 = vmatprep.mubr.f32.mxu0 %v2280_v41  ;;  %v1483_v44 = vsel %vm1479_vm8, %v1476_v39, %v1478_v37  ;;  %v1482_v45 = vsel %vm1479_vm8, %v1474_v34, %v1476_v39 }
 0x14f   : > { %2187 = vmatprep.subr.msk.mxu1 %vm467_vm2, %v1309_v43 }
 0x150   : > { %2188 = vmatpush1.msk.msra.mxu1 %vm467_vm2, %v1308_v42 }
 0x151   : > { %2189 = vmatmul.mubr.msk.f32.vlgmr.msra.gmra.mrb[0].mxu1 %vm463_vm3, %v2183_v38  ;;  %2194 = vmatprep.subr.msk.mxu1 %vm467_vm2, %v1483_v44  ;;  %v1472_v46 = vpop.permute.xlu1 %1471  ;;  %v1646_v47 = vpop.permute.xlu0 %1645 }
 0x152   : > { %v1480_v48 = vsel %vm1479_vm8, %v1470_v35, %v1472_v46  ;;  %v1481_v49 = vsel %vm1479_vm8, %v1472_v46, %v1474_v34  ;;  %2195 = vmatpush1.msk.msra.mxu1 %vm467_vm2, %v1482_v45  ;;  %1630 = vmatprep.mubr.f32.mxu1 %v2280_v41  ;;  %v1654_v53 = vsel %vm1653_vm9, %v1644_v36, %v1646_v47  ;;  %v2038_v34 = vld [vmem:[%s2601_s9] sm:$0xff] }
 0x153   : > { %2191 = vmatprep.subr.msk.mxu0 %vm467_vm2, %v1481_v49 }
 0x154   : > { %2192 = vmatpush1.msk.msra.mxu0 %vm467_vm2, %v1480_v48 }
 0x155   : > { %2193 = vmatmul.mubr.msk.f32.vlgmr.msra.gmra.mrb[0].mxu0 %vm463_vm3, %v2190_v50  ;;  %v1648_v51 = vpop.permute.xlu1 %1647  ;;  %v1652_v54 = vpop.permute.xlu0 %1651 }
 0x156   : > { %v1655_v52 = vsel %vm1653_vm9, %v1646_v47, %v1648_v51  ;;  %1733 = vmatprep.mubr.f32.mxu0 %v2280_v41 }
 0x157   : > { %2198 = vmatprep.subr.msk.mxu0 %vm467_vm2, %v1655_v52 }
 0x158   : > { %2199 = vmatpush1.msk.msra.mxu0 %vm467_vm2, %v1654_v53 }
 0x159   : > { %2196 = vmatmul.mubr.msk.f32.vlgmr.msra.gmra.mrb[0].mxu1 %vm463_vm3, %v2190_v50  ;;  %v1818_v55 = vpop.permute.xlu1 %1817  ;;  %v1822_v58 = vpop.permute.xlu0 %1821 }
 0x15a   : > { %1804 = vmatprep.mubr.f32.mxu1 %v2280_v41 }
 0x15d   : > { %2200 = vmatmul.mubr.msk.f32.vlgmr.msra.gmra.mrb[0].mxu0 %vm463_vm3, %v2197_v56  ;;  %v1650_v57 = vpop.permute.xlu1 %1649  ;;  %v1824_v1 = vpop.permute.xlu0 %1823 }
 0x15e   : > { %v1656_v59 = vsel %vm1653_vm9, %v1648_v51, %v1650_v57  ;;  %v1657_v60 = vsel %vm1653_vm9, %v1650_v57, %v1652_v54  ;;  %1907 = vmatprep.mubr.f32.mxu0 %v2280_v41  ;;  %v1830_v4 = vsel %vm1827_vm10, %v1822_v58, %v1824_v1 }
 0x15f   : > { %2201 = vmatprep.subr.msk.mxu1 %vm467_vm2, %v1657_v60 }
 0x160   : > { %2202 = vmatpush1.msk.msra.mxu1 %vm467_vm2, %v1656_v59 }
 0x161   : > { %2203 = vmatmul.mubr.msk.f32.vlgmr.msra.gmra.mrb[0].mxu1 %vm463_vm3, %v2197_v56  ;;  %v1820_v61 = vpop.permute.xlu1 %1819 }
 0x162   : > { %v1828_v62 = vsel %vm1827_vm10, %v1818_v55, %v1820_v61  ;;  %v1829_v63 = vsel %vm1827_vm10, %v1820_v61, %v1822_v58  ;;  %1978 = vmatprep.mubr.f32.mxu1 %v2280_v41  ;;  %v1999_v41 = vld [vmem:[%s357_s17] sm:$0xf] }
 0x163   : > { %2205 = vmatprep.subr.msk.mxu0 %vm467_vm2, %v1829_v63  ;;  %v2004_v5 = vrot.slane %v1999_v41, %v414_v10  ;;  %v2008_v9 = vrot.slane %v1999_v41, %v418_v11  ;;  %v2012_v18 = vrot.slane %v1999_v41, %v422_v13  ;;  %v2016_v10 = vrot.slane %v1999_v41, %v426_v14 }
 0x164   : > { %2206 = vmatpush1.msk.msra.mxu0 %vm467_vm2, %v1828_v62 }
 0x165   : > { %2207 = vmatmul.mubr.msk.f32.vlgmr.msra.gmra.mrb[0].mxu0 %vm463_vm3, %v2204_v0  ;;  %v1826_v2 = vpop.permute.xlu1 %1825 }
 0x166   : > { %v1831_v3 = vsel %vm1827_vm10, %v1824_v1, %v1826_v2 }
 0x167   : > { %2208 = vmatprep.subr.msk.mxu1 %vm467_vm2, %v1831_v3 }
 0x168   : > { %2209 = vmatpush1.msk.msra.mxu1 %vm467_vm2, %v1830_v4 }
 0x169   : > { %2210 = vmatmul.mubr.msk.f32.vlgmr.msra.gmra.mrb[0].mxu1 %vm463_vm3, %v2204_v0 }
 0x16e   : > { %v1993_v6 = vpop.permute.xlu0 %1992 }
 0x238   : > { %v1909_v7 = vpop.f32.mrb[0].mxu0 }
 0x239   : > { %v1995_v12 = vadd.f32 %v1993_v6, %v1909_v7  ;;  %v1911_v15 = vpop.f32.mrb[1].mxu0 }
 0x23a   : > { %v1996_v16 = vadd.f32 %v1993_v6, %v1911_v15 }
 0x23b   : > { %v2021_v17 = vmul.f32 %v2004_v5, %v1995_v12 }
 0x23c   : > { %v2022_v19 = vmul.f32 %v2008_v9, %v1996_v16  ;;  %v1980_v20 = vpop.f32.mrb[0].mxu1 }
 0x23d   : > { %2025 = vst [vmem:[%s2364_s27] sm:$0xff] %v2021_v17  ;;  %v2039_v21 = vmul.f32 %v2021_v17, %v2021_v17  ;;  %v1997_v22 = vadd.f32 %v1993_v6, %v1980_v20  ;;  %v1982_v23 = vpop.f32.mrb[1].mxu1 }
 0x23e   : > { %2026 = vst [vmem:[%s2364_s27 + $0x8] sm:$0xff] %v2022_v19  ;;  %v2040_v11 = vmul.f32 %v2022_v19, %v2022_v19  ;;  %v1998_v24 = vadd.f32 %v1993_v6, %v1982_v23  ;;  %v2030_v25 = vadd.f32 %v2022_v19, %v2021_v17 }
 0x23f   : > { %v2023_v26 = vmul.f32 %v2012_v18, %v1997_v22 }
 0x240   : > { %v2024_v27 = vmul.f32 %v2016_v10, %v1998_v24  ;;  %v2043_v28 = vadd.f32 %v2040_v11, %v2039_v21 }
 0x241   : > { %2027 = vst [vmem:[%s2364_s27 + $0x10] sm:$0xff] %v2023_v26  ;;  %v2031_v29 = vadd.f32 %v2030_v25, %v2023_v26  ;;  %v2041_v13 = vmul.f32 %v2023_v26, %v2023_v26 }
 0x242   : > { %2028 = vst [vmem:[%s2364_s27 + $0x18] sm:$0xff] %v2024_v27  ;;  %v2042_v30 = vmul.f32 %v2024_v27, %v2024_v27 }
 0x243   : > { %v2032_v31 = vadd.f32 %v2031_v29, %v2024_v27  ;;  %v2044_v8 = vadd.f32 %v2043_v28, %v2041_v13 }
 0x245   : > { %2033 = vadd.xlane.f32.xlu1 %v2032_v31  ;;  %v2045_v14 = vadd.f32 %v2044_v8, %v2042_v30 }
 0x247   : > { %2046 = vadd.xlane.f32.xlu0 %v2045_v14 }
 0x2d2   : > { %v2034_v33 = vpop.xlane.xlu1 %2033 }
 0x2d3   : > { %v2035_v35 = vadd.f32 %v2034_v33, %v2029_v32 }
 0x2d4   : > { %v2047_v36 = vpop.xlane.xlu0 %2046 }
 0x2d5   : > { %2037 = vst.msk [vmem:[%s2600_s8] sm:$0xff] %vm2036_vm11, %v2035_v35  ;;  %v2048_v37 = vadd.f32 %v2047_v36, %v2038_v34 }
 0x2d7   : > { %2049 = vst.msk [vmem:[%s2601_s9] sm:$0xff] %vm2036_vm11, %v2048_v37 }
 0x2d8 PF: > { %s20_s30 = sadd.s32 1, %s2274_s30  }
 0x2d9   : > { %p17_p6 = scmp.ge.s32.totalorder %s20_s30, 7  }
 0x2db   :  { %19 = sbr.rel (!%p17_p6) target bundleno = 1 (0x1), region = 112 }

// kernel: gen_block_forward.5
= control target key start
LH: loop header
LB: loop body
LE: loop exit
PB: predicated region body
PF: predicated region fallthrough
CT: control target
= control target key end

     0   :  { %s2142_s24 = smov 0   ;;  %s2306_s0 = inlined_call_operand.vmem [shape: f32[5,8,582], index: 0, kind: input, shape index: {}]   ;;  %s2307_s1 = inlined_call_operand.vmem [shape: f32[5,1,582], index: 1, kind: input, shape index: {}]   ;;  %s2308_s2 = inlined_call_operand.vmem [shape: f32[9,8,8], index: 2, kind: input, shape index: {}]   ;;  %s2309_s3 = inlined_call_operand.vmem [shape: f32[8,1], index: 3, kind: input, shape index: {}]   ;;  %s2310_s4 = inlined_call_operand.vmem [shape: f32[8,1], index: 4, kind: input, shape index: {}]   ;;  %s2311_s5 = inlined_call_operand.vmem [shape: f32[8,1], index: 5, kind: input, shape index: {}]   ;;  %s2312_s6 = inlined_call_operand.vmem [shape: f32[8,2560], index: 6, kind: input, shape index: {}]   ;;  %s2313_s7 = inlined_call_operand.vmem [shape: f32[8,2560], index: 7, kind: output, shape index: {}]  }
   0x1 LB: > { %s2148_s25 = sadd.s32 4294967295, %s2090_s24   ;;  %p1997_p0 = scmp.ge.s32.totalorder %s2090_s24, 1  ;;  %s2090_s24 = sphi %s2142_s24, %s17_s24  }
   0x2   : > { %p257_p1 = scmp.lt.s32.totalorder %s2090_s24, 6 }
   0x4   : > { %p258_p2 = pnand %p1997_p0, %p257_p1 }
   0x5   : > { %v324_v0 = vld [vmem:[%s2310_s4] sm:$0xff] (!%p258_p2)  ;;  %v2092_v1 = vmov (!%p258_p2), 0   ;;  %p298_p3 = scmp.lt.s32.totalorder (!%p258_p2), %s2148_s25, 4  ;;  %v353_v3 = vlaneseq (!%p258_p2)  ;;  %v2093_v27 = vmov (!%p258_p2), 0.0   ;;  %s2094_s16 = smov (!%p258_p2), 127   ;;  %vm401_vm0 = vcmask (!%p258_p2), 1039360  }
   0x6   : > { %261 = sbr.rel (%p258_p2) target bundleno = 560 (0x230), region = 48  ;;  %2083 = vset.pattern.permute.xlu0 (!%p258_p2), %v2092_v1  ;;  %v335_v2 = vld [vmem:[%s2311_s5] sm:$0xff] (!%p258_p2)  ;;  %478 = vmatprep.mubr.f32.mxu0 (!%p258_p2), %v2093_v27  ;;  %s2095_s17 = smov (!%p258_p2), 126   ;;  %v2003_v51 = vld [vmem:[%s2308_s2 + $0x8] sm:$0xff] (!%p258_p2)  ;;  %vm410_vm1 = vcmask (!%p258_p2), 64512   ;;  %vm713_vm2 = vcmask (!%p258_p2), 1031168  }
   0x7   : > { %327 = vperm.xlu0 (!%p258_p2), %2083, %v324_v0   ;;  %v354_v4 = vshrl.u32 (!%p258_p2), %v353_v3, 7  ;;  %549 = vmatprep.mubr.f32.mxu1 (!%p258_p2), %v2093_v27  ;;  %s2096_s18 = smov (!%p258_p2), 94   ;;  %s2097_s19 = smov (!%p258_p2), 93   ;;  %v1891_v44 = vld [vmem:[%s2309_s3] sm:$0xff] (!%p258_p2)  ;;  %v2008_v3 = vld [vmem:[%s2308_s2 + $0x10] sm:$0xff] (!%p258_p2)  ;;  %vm883_vm3 = vcmask (!%p258_p2), 769024  }
   0x8   : > { %s2098_s20 = smov (!%p258_p2), 92   ;;  %s2099_s21 = smov (!%p258_p2), 60   ;;  %v383_v59 = vld [vmem:[%s2308_s2] sm:$0xff] (!%p258_p2)  ;;  %vm1053_vm4 = vcmask (!%p258_p2), 760832   ;;  %vm1223_vm5 = vcmask (!%p258_p2), 752640   ;;  %vm1393_vm6 = vcmask (!%p258_p2), 490496  }
   0x9   : > { %v359_v10 = vsub.s32 (!%p258_p2), 1, %v354_v4  ;;  %v367_v11 = vsub.s32 (!%p258_p2), 3, %v354_v4  ;;  %v355_v13 = vsub.s32 (!%p258_p2), 0, %v354_v4  ;;  %v363_v19 = vsub.s32 (!%p258_p2), 2, %v354_v4  ;;  %s2100_s22 = smov (!%p258_p2), 59   ;;  %s2101_s23 = smov (!%p258_p2), 58  }
   0xa   : > { %v371_v31 = vsub.s32 (!%p258_p2), 4, %v354_v4  ;;  %vm1563_vm7 = vcmask (!%p258_p2), 482304   ;;  %vm1733_vm8 = vcmask (!%p258_p2), 474112  }
   0xb   : > { %338 = vperm.xlu0 (!%p258_p2), %2083, %v335_v2  }
   0xd   : > { %s299_s30 = scalar_select %p298_p3, %s2148_s25, 4 }
   0xf   : > { %s2063_s8 = smul.u32 40, %s299_s30 }
  0x10   : > { %s2064_s9 = smul.u32 5, %s299_s30 }
  0x11   : > { %s302_s12 = scalar_lea.vmem %s2306_s0, %s2063_s8 }
  0x12   : > { %s306_s15 = scalar_lea.vmem %s2307_s1, %s2064_s9  ;;  %v319_v5 = vld [vmem:[%s302_s12] sm:$0xff]  ;;  %v320_v7 = vld [vmem:[%s302_s12 + $0x8] sm:$0xff]  ;;  %v321_v8 = vld [vmem:[%s302_s12 + $0x10] sm:$0xff] }
  0x13   : > { %v322_v9 = vld [vmem:[%s302_s12 + $0x18] sm:$0xff]  ;;  %v351_v12 = vld [vmem:[%s306_s15] sm:$0x1f] }
  0x14   : > { %v323_v14 = vld [vmem:[%s302_s12 + $0x20] sm:$0xff]  ;;  %v360_v21 = vrot.slane %v351_v12, %v359_v10  ;;  %v368_v22 = vrot.slane %v351_v12, %v367_v11  ;;  %v356_v33 = vrot.slane %v351_v12, %v355_v13  ;;  %v364_v34 = vrot.slane %v351_v12, %v363_v19  ;;  %v2011_v11 = vld [vmem:[%s2308_s2 + $0x18] sm:$0xff] }
  0x15   : > { %v372_v40 = vrot.slane %v351_v12, %v371_v31 }
  0x86   : > { %v328_v6 = vpop.permute.xlu0 %327 }
  0x87   : > { %v330_v15 = vmul.f32 %v328_v6, %v319_v5  ;;  %v331_v16 = vmul.f32 %v328_v6, %v320_v7  ;;  %v332_v17 = vmul.f32 %v328_v6, %v321_v8  ;;  %v333_v18 = vmul.f32 %v328_v6, %v322_v9 }
  0x88   : > { %v334_v28 = vmul.f32 %v328_v6, %v323_v14 }
  0x8a   : > { %v339_v20 = vpop.permute.xlu0 %338 }
  0x8b   : > { %v341_v23 = vadd.f32 %v339_v20, %v330_v15  ;;  %v342_v24 = vadd.f32 %v339_v20, %v331_v16  ;;  %v343_v25 = vadd.f32 %v339_v20, %v332_v17  ;;  %v344_v26 = vadd.f32 %v339_v20, %v333_v18 }
  0x8c   : > { %v345_v32 = vadd.f32 %v339_v20, %v334_v28 }
  0x8d   : > { %v347_v29 = vmax.f32 %v342_v24, 0.0  ;;  %v349_v30 = vmax.f32 %v344_v26, 0.0  ;;  %v346_v35 = vmax.f32 %v341_v23, 0.0  ;;  %v348_v36 = vmax.f32 %v343_v25, 0.0 }
  0x8e   : > { %v350_v39 = vmax.f32 %v345_v32, 0.0  ;;  %v2017_v32 = vld [vmem:[%s2308_s2 + $0x28] sm:$0xff] }
  0x8f   : > { %v2168_v37 = vmul.f32 %v360_v21, %v347_v29  ;;  %v2170_v38 = vmul.f32 %v368_v22, %v349_v30  ;;  %v2174_v41 = vmul.f32 %v356_v33, %v346_v35  ;;  %v2176_v42 = vmul.f32 %v364_v34, %v348_v36  ;;  %v2014_v22 = vld [vmem:[%s2308_s2 + $0x20] sm:$0xff] }
  0x90   : > { %v382_v43 = vmul.f32 %v372_v40, %v350_v39 }
  0x91   : > { %397 = vrot.lane.b32.xlu0 %v2170_v38, %s2094_s16  ;;  %393 = vrot.lane.b32.xlu1 %v2168_v37, %s2094_s16 }
  0x95   : > { %395 = vrot.lane.b32.xlu1 %v2176_v42, %s2094_s16  ;;  %391 = vrot.lane.b32.xlu0 %v2174_v41, %s2094_s16 }
  0x99   : > { %399 = vrot.lane.b32.xlu1 %v382_v43, %s2094_s16  ;;  %707 = vrot.lane.b32.xlu0 %v2176_v42, %s2095_s17 }
  0x9d   : > { %705 = vrot.lane.b32.xlu1 %v2168_v37, %s2095_s17  ;;  %711 = vrot.lane.b32.xlu0 %v382_v43, %s2095_s17 }
  0xa1   : > { %709 = vrot.lane.b32.xlu1 %v2170_v38, %s2095_s17  ;;  %875 = vrot.lane.b32.xlu0 %v2168_v37, %s2096_s18 }
  0xa5   : > { %703 = vrot.lane.b32.xlu1 %v2174_v41, %s2095_s17  ;;  %879 = vrot.lane.b32.xlu0 %v2170_v38, %s2096_s18 }
  0xa9   : > { %877 = vrot.lane.b32.xlu1 %v2176_v42, %s2096_s18  ;;  %873 = vrot.lane.b32.xlu0 %v2174_v41, %s2096_s18 }
  0xad   : > { %881 = vrot.lane.b32.xlu1 %v382_v43, %s2096_s18  ;;  %1047 = vrot.lane.b32.xlu0 %v2176_v42, %s2097_s19 }
  0xb1   : > { %1045 = vrot.lane.b32.xlu1 %v2168_v37, %s2097_s19  ;;  %1051 = vrot.lane.b32.xlu0 %v382_v43, %s2097_s19 }
  0xb5   : > { %1049 = vrot.lane.b32.xlu1 %v2170_v38, %s2097_s19  ;;  %1215 = vrot.lane.b32.xlu0 %v2168_v37, %s2098_s20 }
  0xb9   : > { %1043 = vrot.lane.b32.xlu1 %v2174_v41, %s2097_s19  ;;  %1219 = vrot.lane.b32.xlu0 %v2170_v38, %s2098_s20 }
  0xbd   : > { %1217 = vrot.lane.b32.xlu1 %v2176_v42, %s2098_s20  ;;  %1213 = vrot.lane.b32.xlu0 %v2174_v41, %s2098_s20 }
  0xc1   : > { %1221 = vrot.lane.b32.xlu1 %v382_v43, %s2098_s20  ;;  %1387 = vrot.lane.b32.xlu0 %v2176_v42, %s2099_s21 }
  0xc5   : > { %1385 = vrot.lane.b32.xlu1 %v2168_v37, %s2099_s21  ;;  %1391 = vrot.lane.b32.xlu0 %v382_v43, %s2099_s21 }
  0xc9   : > { %1389 = vrot.lane.b32.xlu1 %v2170_v38, %s2099_s21  ;;  %1555 = vrot.lane.b32.xlu0 %v2168_v37, %s2100_s22 }
  0xcd   : > { %1383 = vrot.lane.b32.xlu1 %v2174_v41, %s2099_s21  ;;  %1559 = vrot.lane.b32.xlu0 %v2170_v38, %s2100_s22 }
  0xd1   : > { %1557 = vrot.lane.b32.xlu1 %v2176_v42, %s2100_s22  ;;  %1553 = vrot.lane.b32.xlu0 %v2174_v41, %s2100_s22 }
  0xd5   : > { %1561 = vrot.lane.b32.xlu1 %v382_v43, %s2100_s22  ;;  %1727 = vrot.lane.b32.xlu0 %v2176_v42, %s2101_s23 }
  0xd9   : > { %1725 = vrot.lane.b32.xlu1 %v2168_v37, %s2101_s23  ;;  %1731 = vrot.lane.b32.xlu0 %v382_v43, %s2101_s23 }
  0xdd   : > { %1729 = vrot.lane.b32.xlu1 %v2170_v38, %s2101_s23  ;;  %1894 = vperm.xlu0 %2083, %v1891_v44  }
  0xe1   : > { %1723 = vrot.lane.b32.xlu1 %v2174_v41, %s2101_s23  ;;  %s1999_s23 = sshll.u32 %s2148_s25, 2 }
  0xe2   : > { %p308_p4 = scmp.lt.s32.totalorder %s1999_s23, 19 }
  0xe4   : > { %s2315_s23 = smov (!%p308_p4, %s1999_s23), 19 }
  0xe5   : > { %s2000_s26 = sshll.u32 %s2315_s23, 3 }
  0xe6   : > { %s311_s29 = scalar_lea.vmem %s2312_s6, %s2000_s26  ;;  %s317_s9 = scalar_lea.vmem %s2313_s7, %s2000_s26 }
 0x103   : > { %v398_v45 = vpop.permute.xlu0 %397  ;;  %v394_v46 = vpop.permute.xlu1 %393 }
 0x107   : > { %v396_v47 = vpop.permute.xlu1 %395  ;;  %v392_v48 = vpop.permute.xlu0 %391 }
 0x108   : > { %v403_v49 = vsel %vm401_vm0, %v394_v46, %v396_v47  ;;  %v402_v50 = vsel %vm401_vm0, %v392_v48, %v394_v46  ;;  %v404_v55 = vsel %vm401_vm0, %v396_v47, %v398_v45 }
 0x109   : > { %414 = vmatprep.subr.mxu0 %v403_v49 }
 0x10a   : > { %415 = vmatpush1.msra.mxu0 %v402_v50 }
 0x10b   : > { %v400_v52 = vpop.permute.xlu1 %399  ;;  %559 = vmatprep.subr.mxu0 %v2168_v37  ;;  %v708_v53 = vpop.permute.xlu0 %707  ;;  %2004 = vmatmul.mubr.msk.f32.vlgmr.msra.gmra.mrb[0].mxu0 %vm410_vm1, %v2003_v51 }
 0x10c   : > { %560 = vmatpush1.msra.mxu0 %v2174_v41  ;;  %v405_v54 = vsel %vm401_vm0, %v398_v45, %v400_v52  ;;  %623 = vmatprep.mubr.f32.mxu0 %v2093_v27  ;;  %v2020_v41 = vld [vmem:[%s2308_s2 + $0x30] sm:$0xff] }
 0x10d   : > { %485 = vmatprep.subr.mxu1 %v405_v54 }
 0x10e   : > { %486 = vmatpush1.msra.mxu1 %v404_v55 }
 0x10f   : > { %2005 = vmatmul.mubr.msk.f32.vlgmr.msra.gmra.mrb[0].mxu1 %vm410_vm1, %v2003_v51  ;;  %630 = vmatprep.subr.mxu1 %v2170_v38  ;;  %v706_v56 = vpop.permute.xlu1 %705  ;;  %v712_v57 = vpop.permute.xlu0 %711  ;;  %v2023_v51 = vld [vmem:[%s2308_s2 + $0x38] sm:$0xff] }
 0x110   : > { %631 = vmatpush1.msra.mxu1 %v2176_v42  ;;  %v715_v58 = vsel %vm713_vm2, %v706_v56, %v708_v53  ;;  %694 = vmatprep.mubr.f32.mxu1 %v2093_v27 }
 0x111   : > { %725 = vmatprep.subr.mxu0 %v715_v58 }
 0x113   : > { %v710_v60 = vpop.permute.xlu1 %709  ;;  %v876_v61 = vpop.permute.xlu0 %875  ;;  %2006 = vmatmul.mubr.msk.f32.vlgmr.msra.gmra.mrb[0].mxu0 %vm410_vm1, %v383_v59 }
 0x114   : > { %v717_v62 = vsel %vm713_vm2, %v710_v60, %v712_v57  ;;  %789 = vmatprep.mubr.f32.mxu0 %v2093_v27  ;;  %v716_v63 = vsel %vm713_vm2, %v708_v53, %v710_v60  ;;  %v2026_v60 = vld [vmem:[%s2308_s2 + $0x40] sm:$0xff] }
 0x115   : > { %796 = vmatprep.subr.mxu1 %v717_v62 }
 0x117   : > { %2007 = vmatmul.mubr.msk.f32.vlgmr.msra.gmra.mrb[0].mxu1 %vm410_vm1, %v383_v59  ;;  %v704_v0 = vpop.permute.xlu1 %703  ;;  %v880_v1 = vpop.permute.xlu0 %879 }
 0x118   : > { %v714_v2 = vsel %vm713_vm2, %v704_v0, %v706_v56  ;;  %797 = vmatpush1.msra.mxu1 %v716_v63  ;;  %860 = vmatprep.mubr.f32.mxu1 %v2093_v27  ;;  %v1903_v0 = vld [vmem:[%s311_s29 + $0x10] sm:$0xff] }
 0x119   : > { %726 = vmatpush1.msra.mxu0 %v714_v2 }
 0x11b   : > { %v878_v4 = vpop.permute.xlu1 %877  ;;  %v874_v5 = vpop.permute.xlu0 %873  ;;  %2009 = vmatmul.mubr.msk.f32.vlgmr.msra.gmra.mrb[0].mxu0 %vm410_vm1, %v2008_v3 }
 0x11c   : > { %v884_v6 = vsel %vm883_vm3, %v874_v5, %v876_v61  ;;  %v885_v7 = vsel %vm883_vm3, %v876_v61, %v878_v4  ;;  %959 = vmatprep.mubr.f32.mxu0 %v2093_v27  ;;  %v886_v12 = vsel %vm883_vm3, %v878_v4, %v880_v1 }
 0x11d   : > { %895 = vmatprep.subr.mxu0 %v885_v7  ;;  %v1901_v7 = vld [vmem:[%s311_s29] sm:$0xff] }
 0x11e   : > { %896 = vmatpush1.msra.mxu0 %v884_v6 }
 0x11f   : > { %v882_v8 = vpop.permute.xlu1 %881  ;;  %v1048_v9 = vpop.permute.xlu0 %1047  ;;  %2010 = vmatmul.mubr.msk.f32.vlgmr.msra.gmra.mrb[0].mxu1 %vm410_vm1, %v2008_v3  ;;  %v1904_v3 = vld [vmem:[%s311_s29 + $0x18] sm:$0xff] }
 0x120   : > { %v887_v10 = vsel %vm883_vm3, %v880_v1, %v882_v8  ;;  %1030 = vmatprep.mubr.f32.mxu1 %v2093_v27 }
 0x121   : > { %966 = vmatprep.subr.mxu1 %v887_v10 }
 0x122   : > { %967 = vmatpush1.msra.mxu1 %v886_v12 }
 0x123   : > { %v1046_v13 = vpop.permute.xlu1 %1045  ;;  %v1052_v14 = vpop.permute.xlu0 %1051  ;;  %2012 = vmatmul.mubr.msk.f32.vlgmr.msra.gmra.mrb[0].mxu0 %vm410_vm1, %v2011_v11 }
 0x124   : > { %v1055_v15 = vsel %vm1053_vm4, %v1046_v13, %v1048_v9  ;;  %1129 = vmatprep.mubr.f32.mxu0 %v2093_v27 }
 0x125   : > { %1065 = vmatprep.subr.mxu0 %v1055_v15 }
 0x127   : > { %v1050_v16 = vpop.permute.xlu1 %1049  ;;  %v1216_v17 = vpop.permute.xlu0 %1215  ;;  %2013 = vmatmul.mubr.msk.f32.vlgmr.msra.gmra.mrb[0].mxu1 %vm410_vm1, %v2011_v11  ;;  %v1902_v11 = vld [vmem:[%s311_s29 + $0x8] sm:$0xff] }
 0x128   : > { %v1056_v18 = vsel %vm1053_vm4, %v1048_v9, %v1050_v16  ;;  %v1057_v19 = vsel %vm1053_vm4, %v1050_v16, %v1052_v14  ;;  %1200 = vmatprep.mubr.f32.mxu1 %v2093_v27 }
 0x129   : > { %1136 = vmatprep.subr.mxu1 %v1057_v19 }
 0x12a   : > { %1137 = vmatpush1.msra.mxu1 %v1056_v18 }
 0x12b   : > { %v1044_v20 = vpop.permute.xlu1 %1043  ;;  %v1220_v21 = vpop.permute.xlu0 %1219 }
 0x12c   : > { %v1054_v23 = vsel %vm1053_vm4, %v1044_v20, %v1046_v13 }
 0x12d   : > { %1066 = vmatpush1.msra.mxu0 %v1054_v23 }
 0x12e   : > { %2015 = vmatmul.mubr.msk.f32.vlgmr.msra.gmra.mrb[0].mxu0 %vm410_vm1, %v2014_v22 }
 0x12f   : > { %v1218_v24 = vpop.permute.xlu1 %1217  ;;  %v1214_v25 = vpop.permute.xlu0 %1213  ;;  %2016 = vmatmul.mubr.msk.f32.vlgmr.msra.gmra.mrb[0].mxu1 %vm410_vm1, %v2014_v22  ;;  %1299 = vmatprep.mubr.f32.mxu0 %v2093_v27 }
 0x130   : > { %v1224_v26 = vsel %vm1223_vm5, %v1214_v25, %v1216_v17  ;;  %v1225_v28 = vsel %vm1223_vm5, %v1216_v17, %v1218_v24  ;;  %1370 = vmatprep.mubr.f32.mxu1 %v2093_v27  ;;  %v1226_v33 = vsel %vm1223_vm5, %v1218_v24, %v1220_v21 }
 0x131   : > { %1235 = vmatprep.subr.mxu0 %v1225_v28 }
 0x132   : > { %1236 = vmatpush1.msra.mxu0 %v1224_v26 }
 0x133   : > { %v1222_v29 = vpop.permute.xlu1 %1221  ;;  %v1388_v30 = vpop.permute.xlu0 %1387 }
 0x134   : > { %v1227_v31 = vsel %vm1223_vm5, %v1220_v21, %v1222_v29 }
 0x135   : > { %1306 = vmatprep.subr.mxu1 %v1227_v31 }
 0x136   : > { %1307 = vmatpush1.msra.mxu1 %v1226_v33  ;;  %2018 = vmatmul.mubr.msk.f32.vlgmr.msra.gmra.mrb[0].mxu0 %vm410_vm1, %v2017_v32 }
 0x137   : > { %v1386_v34 = vpop.permute.xlu1 %1385  ;;  %v1392_v35 = vpop.permute.xlu0 %1391  ;;  %2019 = vmatmul.mubr.msk.f32.vlgmr.msra.gmra.mrb[0].mxu1 %vm410_vm1, %v2017_v32  ;;  %1469 = vmatprep.mubr.f32.mxu0 %v2093_v27 }
 0x138   : > { %v1395_v36 = vsel %vm1393_vm6, %v1386_v34, %v1388_v30  ;;  %1540 = vmatprep.mubr.f32.mxu1 %v2093_v27 }
 0x139   : > { %1405 = vmatprep.subr.mxu0 %v1395_v36 }
 0x13b   : > { %v1390_v37 = vpop.permute.xlu1 %1389  ;;  %v1556_v38 = vpop.permute.xlu0 %1555 }
 0x13c   : > { %v1396_v39 = vsel %vm1393_vm6, %v1388_v30, %v1390_v37  ;;  %v1397_v40 = vsel %vm1393_vm6, %v1390_v37, %v1392_v35 }
 0x13d   : > { %1476 = vmatprep.subr.mxu1 %v1397_v40 }
 0x13e   : > { %1477 = vmatpush1.msra.mxu1 %v1396_v39 }
 0x13f   : > { %v1384_v42 = vpop.permute.xlu1 %1383  ;;  %v1560_v43 = vpop.permute.xlu0 %1559  ;;  %2022 = vmatmul.mubr.msk.f32.vlgmr.msra.gmra.mrb[0].mxu1 %vm410_vm1, %v2020_v41 }
 0x140   : > { %v1394_v44 = vsel %vm1393_vm6, %v1384_v42, %v1386_v34  ;;  %1710 = vmatprep.mubr.f32.mxu1 %v2093_v27 }
 0x141   : > { %1406 = vmatpush1.msra.mxu0 %v1394_v44 }
 0x142   : > { %2021 = vmatmul.mubr.msk.f32.vlgmr.msra.gmra.mrb[0].mxu0 %vm410_vm1, %v2020_v41 }
 0x143   : > { %v1558_v45 = vpop.permute.xlu1 %1557  ;;  %v1554_v46 = vpop.permute.xlu0 %1553  ;;  %1639 = vmatprep.mubr.f32.mxu0 %v2093_v27 }
 0x144   : > { %v1564_v47 = vsel %vm1563_vm7, %v1554_v46, %v1556_v38  ;;  %v1565_v48 = vsel %vm1563_vm7, %v1556_v38, %v1558_v45  ;;  %v1566_v52 = vsel %vm1563_vm7, %v1558_v45, %v1560_v43 }
 0x145   : > { %1575 = vmatprep.subr.mxu0 %v1565_v48 }
 0x146   : > { %1576 = vmatpush1.msra.mxu0 %v1564_v47 }
 0x147   : > { %v1562_v49 = vpop.permute.xlu1 %1561  ;;  %v1728_v53 = vpop.permute.xlu0 %1727 }
 0x148   : > { %v1567_v50 = vsel %vm1563_vm7, %v1560_v43, %v1562_v49 }
 0x149   : > { %1646 = vmatprep.subr.mxu1 %v1567_v50 }
 0x14a   : > { %1647 = vmatpush1.msra.mxu1 %v1566_v52  ;;  %2024 = vmatmul.mubr.msk.f32.vlgmr.msra.gmra.mrb[0].mxu0 %vm410_vm1, %v2023_v51 }
 0x14b   : > { %v1726_v54 = vpop.permute.xlu1 %1725  ;;  %2025 = vmatmul.mubr.msk.f32.vlgmr.msra.gmra.mrb[0].mxu1 %vm410_vm1, %v2023_v51  ;;  %1809 = vmatprep.mubr.f32.mxu0 %v2093_v27  ;;  %v1732_v56 = vpop.permute.xlu0 %1731 }
 0x14c   : > { %v1735_v55 = vsel %vm1733_vm8, %v1726_v54, %v1728_v53  ;;  %1880 = vmatprep.mubr.f32.mxu1 %v2093_v27 }
 0x14d   : > { %1745 = vmatprep.subr.mxu0 %v1735_v55 }
 0x14f   : > { %v1730_v57 = vpop.permute.xlu1 %1729 }
 0x150   : > { %v1736_v58 = vsel %vm1733_vm8, %v1728_v53, %v1730_v57  ;;  %v1737_v59 = vsel %vm1733_vm8, %v1730_v57, %v1732_v56 }
 0x151   : > { %1816 = vmatprep.subr.mxu1 %v1737_v59 }
 0x152   : > { %1817 = vmatpush1.msra.mxu1 %v1736_v58 }
 0x153   : > { %v1724_v61 = vpop.permute.xlu1 %1723  ;;  %2028 = vmatmul.mubr.msk.f32.vlgmr.msra.gmra.mrb[0].mxu1 %vm410_vm1, %v2026_v60 }
 0x154   : > { %v1734_v62 = vsel %vm1733_vm8, %v1724_v61, %v1726_v54 }
 0x155   : > { %1746 = vmatpush1.msra.mxu0 %v1734_v62 }
 0x156   : > { %2027 = vmatmul.mubr.msk.f32.vlgmr.msra.gmra.mrb[0].mxu0 %vm410_vm1, %v2026_v60 }
 0x15c   : > { %v1895_v27 = vpop.permute.xlu0 %1894 }
 0x226   : > { %v1882_v63 = vpop.f32.mrb[0].mxu1 }
 0x227   : > { %v1899_v1 = vadd.f32 %v1895_v27, %v1882_v63  ;;  %v1884_v2 = vpop.f32.mrb[1].mxu1 }
 0x228   : > { %v1900_v4 = vadd.f32 %v1895_v27, %v1884_v2 }
 0x229   : > { %v1907_v5 = vadd.f32 %v1903_v0, %v1899_v1  ;;  %v1811_v6 = vpop.f32.mrb[0].mxu0 }
 0x22a   : > { %v1908_v8 = vadd.f32 %v1904_v3, %v1900_v4  ;;  %v1897_v9 = vadd.f32 %v1895_v27, %v1811_v6  ;;  %v1813_v10 = vpop.f32.mrb[1].mxu0 }
 0x22b   : > { %1911 = vst [vmem:[%s317_s9 + $0x10] sm:$0xff] %v1907_v5  ;;  %v1898_v12 = vadd.f32 %v1895_v27, %v1813_v10 }
 0x22c   : > { %1912 = vst [vmem:[%s317_s9 + $0x18] sm:$0xff] %v1908_v8  ;;  %v1905_v13 = vadd.f32 %v1901_v7, %v1897_v9 }
 0x22d   : > { %v1906_v14 = vadd.f32 %v1902_v11, %v1898_v12 }
 0x22e   : > { %1909 = vst [vmem:[%s317_s9] sm:$0xff] %v1905_v13 }
 0x22f   : > { %1910 = vst [vmem:[%s317_s9 + $0x8] sm:$0xff] %v1906_v14 }
 0x230 PF: > { %s17_s24 = sadd.s32 1, %s2090_s24  }
 0x231   : > { %p14_p5 = scmp.ge.s32.totalorder %s17_s24, 7  }
 0x233   :  { %16 = sbr.rel (!%p14_p5) target bundleno = 1 (0x1), region = 92 }

</bundles_post_ra>
